<compile_context>
chip_gen: v5e
topology: v5e:2x2
jax: 0.10.0
libtpu: 0.0.40
codegen_flags: <defaults>
</compile_context>

<pallas_src>
import math

import jax
import jax.numpy as jnp
from jax.experimental import pallas as pl
from jax.experimental.pallas import tpu as pltpu

# ----------------------- tiny "phobert-like" config -----------------------
VOCAB = 64
HIDDEN = 32
NUM_HEADS = 4
HEAD_DIM = HIDDEN // NUM_HEADS
INTERMEDIATE = 64
NUM_LAYERS = 2
MAX_POS = 20
NUM_LABELS = 3
PAD_ID = 1            # RoBERTa padding_idx
LN_EPS = 1e-5
BATCH = 2
SEQ = 8

BS = BATCH * SEQ                      # 16 token rows
ROWS3 = BATCH * NUM_HEADS * SEQ       # 64 (b, h, s) attention rows
EMB_ROWS = 96                         # VOCAB + MAX_POS = 84, padded to 96
VEC_LANES = 128                       # every small vector lives on one 128-lane row
LOGIT_PAD = 128                       # lane-dense classifier output slab
NEG_BLOCK = -1e9                      # cross-(batch,head) mask (finite, not -inf)

# vec_slab row layout (all 1-D biases / LN params, one per 128-lane row)
_ROW_EMB_LN_G = 0
_ROW_EMB_LN_B = 1
_ROWS_PER_LAYER = 8                   # qkv_b, ao_b, ln1_g, ln1_b, i_b, fo_b, ln2_g, ln2_b
_ROW_LAYER0 = 2
_ROW_CLS_DENSE_B = _ROW_LAYER0 + NUM_LAYERS * _ROWS_PER_LAYER
_ROW_CLS_OUT_B = _ROW_CLS_DENSE_B + 1
VEC_ROWS = _ROW_CLS_OUT_B + 1


# --------------------------- in-kernel helpers -----------------------------
def _layernorm(x, g, b, eps=LN_EPS):
    """x: (M, H) f32; g, b: (1, H)."""
    mean = jnp.mean(x, axis=-1, keepdims=True)
    var = jnp.mean((x - mean) ** 2, axis=-1, keepdims=True)
    return (x - mean) * jax.lax.rsqrt(var + eps) * g + b


# --------------------------- fused forward kernel --------------------------
def _fused_forward_kernel(ids_ref, bias_ref, emb_ref, w_ref, fo_ref, cls_ref,
                          vec_ref, logits_ref):
    vecs = vec_ref[...]                                   # (VEC_ROWS, 128)

    def vrow(r, n):
        return vecs[r:r + 1, 0:n]                         # (1, n) static slice

    # ---- embedding lookup as ONE two-hot MXU matmul (word[id] + pos[pos];
    # token-type row already folded into the word table at pack time). ----
    ids = ids_ref[...]                                    # (BS, 2) int32
    col = jax.lax.broadcasted_iota(jnp.int32, (BS, EMB_ROWS), 1)
    two_hot = ((ids[:, 0:1] == col).astype(jnp.float32)
               + (ids[:, 1:2] == col).astype(jnp.float32))
    x = jnp.dot(two_hot, emb_ref[...], preferred_element_type=jnp.float32)   # (BS, H)
    x = _layernorm(x, vrow(_ROW_EMB_LN_G, HIDDEN), vrow(_ROW_EMB_LN_B, HIDDEN))

    # (b,h)-block-diagonal additive attention bias, built once in the wrapper
    # and reused by every layer (hoists all mask broadcasts out of the loops).
    bias = bias_ref[...]                                  # (ROWS3, ROWS3)

    # ------- encoder layers (static unroll, weights stay VMEM-resident) -------
    for l in range(NUM_LAYERS):
        wsl = w_ref[l]                                    # (H, 192) = [qkv_w | ao_w | i_w]
        qkv_w = wsl[:, 0:3 * HIDDEN]
        ao_w = wsl[:, 3 * HIDDEN:4 * HIDDEN]
        i_w = wsl[:, 4 * HIDDEN:4 * HIDDEN + INTERMEDIATE]
        base = _ROW_LAYER0 + l * _ROWS_PER_LAYER
        qkv_b = vrow(base + 0, 3 * HIDDEN)
        ao_b = vrow(base + 1, HIDDEN)
        ln1_g = vrow(base + 2, HIDDEN)
        ln1_b = vrow(base + 3, HIDDEN)
        i_b = vrow(base + 4, INTERMEDIATE)
        fo_b = vrow(base + 5, HIDDEN)
        ln2_g = vrow(base + 6, HIDDEN)
        ln2_b = vrow(base + 7, HIDDEN)

        # fused Q/K/V projection; 1/sqrt(HEAD_DIM) already folded into Q weights.
        qkv = jnp.dot(x, qkv_w, preferred_element_type=jnp.float32) + qkv_b   # (BS, 3H)

        # repack to (b, h, s)-major rows x HEAD_DIM lanes -> (ROWS3, HEAD_DIM)
        def to_heads(off):
            return jnp.concatenate(
                [qkv[b * SEQ:(b + 1) * SEQ,
                     off + h * HEAD_DIM: off + (h + 1) * HEAD_DIM]
                 for b in range(BATCH) for h in range(NUM_HEADS)], axis=0)

        q3 = to_heads(0)
        k3 = to_heads(HIDDEN)
        v3 = to_heads(2 * HIDDEN)

        # block-diagonal attention: 1 score matmul + 1 PV matmul for ALL heads
        # and batches; row-wise softmax is exact because off-block columns sit
        # at -1e9 and exp() to 0.
        s = jnp.dot(q3, k3.T, preferred_element_type=jnp.float32) + bias      # (64, 64)
        m = jnp.max(s, axis=-1, keepdims=True)
        p = jnp.exp(s - m)
        p = p * pl.reciprocal(jnp.sum(p, axis=-1, keepdims=True), approx=True)
        ctx3 = jnp.dot(p, v3, preferred_element_type=jnp.float32)             # (64, D)

        # back to (BS, H) with heads concatenated along lanes
        ctx = jnp.concatenate(
            [jnp.concatenate(
                [ctx3[(b * NUM_HEADS + h) * SEQ:(b * NUM_HEADS + h + 1) * SEQ, :]
                 for h in range(NUM_HEADS)], axis=1)
             for b in range(BATCH)], axis=0)                                   # (BS, H)

        attn_out = jnp.dot(ctx, ao_w, preferred_element_type=jnp.float32) + ao_b
        x = _layernorm(attn_out + x, ln1_g, ln1_b)

        # TODO(synk): HF RoBERTa uses exact (erf) GELU; tanh approximation used
        # here for guaranteed Mosaic lowering (difference ~1e-3).
        ffn = jnp.dot(x, i_w, preferred_element_type=jnp.float32) + i_b
        ffn = jax.nn.gelu(ffn, approximate=True)
        ffn = jnp.dot(ffn, fo_ref[l], preferred_element_type=jnp.float32) + fo_b
        x = _layernorm(ffn + x, ln2_g, ln2_b)

    # ------- classification head, computed for ALL token rows so the output
    # store is a dense (16,128) slab; wrapper picks the <s> (CLS) rows. -------
    dense_w = cls_ref[:, 0:HIDDEN]
    out_w = cls_ref[:, HIDDEN:HIDDEN + LOGIT_PAD]
    h = jnp.tanh(jnp.dot(x, dense_w, preferred_element_type=jnp.float32)
                 + vrow(_ROW_CLS_DENSE_B, HIDDEN))
    logits = (jnp.dot(h, out_w, preferred_element_type=jnp.float32)
              + vrow(_ROW_CLS_OUT_B, LOGIT_PAD))                              # (BS, 128)
    logits_ref[...] = logits.astype(logits_ref.dtype)


def _full_spec(shape):
    zeros = (0,) * len(shape)
    return pl.BlockSpec(shape, lambda i, _z=zeros: _z)


def fused_forward(ids2, attn_bias, packed):
    inputs = (ids2, attn_bias, packed["emb_table"], packed["w_slab"],
              packed["fo_w"], packed["cls_w"], packed["vec_slab"])
    # grid=(1,) is intentional at B=2; for larger batches add a leading
    # "parallel" batch axis so v7x's 2 TensorCores split the work.
    return pl.pallas_call(
        _fused_forward_kernel,
        out_shape=jax.ShapeDtypeStruct((BS, LOGIT_PAD), jnp.float32),
        grid=(1,),
        in_specs=[_full_spec(a.shape) for a in inputs],
        out_specs=_full_spec((BS, LOGIT_PAD)),
        compiler_params=pltpu.CompilerParams(dimension_semantics=("arbitrary",)),
    )(*inputs)


# ------------------------------ model wrapper -------------------------------
@jax.jit
def bert_classifier_forward(packed, input_ids, attention_mask):
    """Equivalent of BERTClassifier.forward(input_ids, attention_mask, labels=None).logits."""
    B, S = input_ids.shape

    # RoBERTa position ids: cumsum over non-pad tokens, offset by padding_idx.
    not_pad = (input_ids != PAD_ID).astype(jnp.int32)
    position_ids = jnp.cumsum(not_pad, axis=1) * not_pad + PAD_ID
    ids2 = jnp.stack([input_ids.reshape(-1),
                      VOCAB + position_ids.reshape(-1)], axis=1).astype(jnp.int32)

    # Full (b,h)-block-diagonal additive attention bias, built once:
    # key padding (1-mask)*-10000 inside blocks, -1e9 on cross blocks.
    mask_bias = (1.0 - attention_mask.astype(jnp.float32)) * -10000.0        # (B, S)
    key_row = jnp.broadcast_to(mask_bias[:, None, :], (B, NUM_HEADS, S)).reshape(-1)
    blk = jnp.arange(ROWS3) // SEQ
    same = blk[:, None] == blk[None, :]
    attn_bias = jnp.where(same, key_row[None, :], NEG_BLOCK).astype(jnp.float32)

    logits_full = fused_forward(ids2, attn_bias, packed)                     # (B*S, 128)
    # TODO(synk): labels!=None loss branch (cross-entropy) not implemented.
    return logits_full.reshape(B, S, LOGIT_PAD)[:, 0, :NUM_LABELS]


# --------------------------- deterministic params --------------------------
def init_params(key):
    def nrm(k, shape):
        return jax.random.normal(k, shape, jnp.float32) * 0.02

    n_keys = 8 + NUM_LAYERS * 16
    keys = iter(jax.random.split(key, n_keys))
    params = {
        "word_emb": nrm(next(keys), (VOCAB, HIDDEN)),
        "pos_emb": nrm(next(keys), (MAX_POS, HIDDEN)),
        "type_emb": nrm(next(keys), (1, HIDDEN)),
        "emb_ln_g": jnp.ones((HIDDEN,), jnp.float32),
        "emb_ln_b": jnp.zeros((HIDDEN,), jnp.float32),
        "cls_dense_w": nrm(next(keys), (HIDDEN, HIDDEN)),
        "cls_dense_b": jnp.zeros((HIDDEN,), jnp.float32),
        "cls_out_w": nrm(next(keys), (HIDDEN, NUM_LABELS)),
        "cls_out_b": jnp.zeros((NUM_LABELS,), jnp.float32),
        "layers": [],
    }
    for _ in range(NUM_LAYERS):
        layer = {
            "q_w": nrm(next(keys), (HIDDEN, HIDDEN)), "q_b": jnp.zeros((HIDDEN,), jnp.float32),
            "k_w": nrm(next(keys), (HIDDEN, HIDDEN)), "k_b": jnp.zeros((HIDDEN,), jnp.float32),
            "v_w": nrm(next(keys), (HIDDEN, HIDDEN)), "v_b": jnp.zeros((HIDDEN,), jnp.float32),
            "ao_w": nrm(next(keys), (HIDDEN, HIDDEN)), "ao_b": jnp.zeros((HIDDEN,), jnp.float32),
            "ln1_g": jnp.ones((HIDDEN,), jnp.float32), "ln1_b": jnp.zeros((HIDDEN,), jnp.float32),
            "i_w": nrm(next(keys), (HIDDEN, INTERMEDIATE)), "i_b": jnp.zeros((INTERMEDIATE,), jnp.float32),
            "fo_w": nrm(next(keys), (INTERMEDIATE, HIDDEN)), "fo_b": jnp.zeros((HIDDEN,), jnp.float32),
            "ln2_g": jnp.ones((HIDDEN,), jnp.float32), "ln2_b": jnp.zeros((HIDDEN,), jnp.float32),
        }
        params["layers"].append(layer)
    return params


def pack_params(params):
    """One-time repack into a handful of lane-dense slabs (few, larger DMAs)."""
    scale = 1.0 / math.sqrt(HEAD_DIM)

    # Embedding table: [word + type[0] ; pos ; zero pad] -> (EMB_ROWS, H)
    word = params["word_emb"] + params["type_emb"][0][None, :]
    emb_table = jnp.zeros((EMB_ROWS, HIDDEN), jnp.float32)
    emb_table = emb_table.at[:VOCAB].set(word)
    emb_table = emb_table.at[VOCAB:VOCAB + MAX_POS].set(params["pos_emb"])

    def lane_pad(v, n=VEC_LANES):
        return jnp.pad(v, (0, n - v.shape[0]))

    w_rows, fo_rows, vec_rows = [], [], []
    vec_rows.append(lane_pad(params["emb_ln_g"]))
    vec_rows.append(lane_pad(params["emb_ln_b"]))
    for lp in params["layers"]:
        # fold 1/sqrt(HEAD_DIM) into the Q projection (weights + bias)
        qkv_w = jnp.concatenate([lp["q_w"] * scale, lp["k_w"], lp["v_w"]], axis=1)   # (H, 3H)
        w_rows.append(jnp.concatenate([qkv_w, lp["ao_w"], lp["i_w"]], axis=1))       # (H, 192)
        fo_rows.append(lp["fo_w"])                                                   # (I, H)
        qkv_b = jnp.concatenate([lp["q_b"] * scale, lp["k_b"], lp["v_b"]], axis=0)
        for v in (qkv_b, lp["ao_b"], lp["ln1_g"], lp["ln1_b"],
                  lp["i_b"], lp["fo_b"], lp["ln2_g"], lp["ln2_b"]):
            vec_rows.append(lane_pad(v))
    vec_rows.append(lane_pad(params["cls_dense_b"]))
    vec_rows.append(lane_pad(params["cls_out_b"]))

    cls_out_w = jnp.pad(params["cls_out_w"], ((0, 0), (0, LOGIT_PAD - NUM_LABELS)))
    cls_w = jnp.concatenate([params["cls_dense_w"], cls_out_w], axis=1)               # (H, 160)

    vec_slab = jnp.stack(vec_rows, axis=0)
    assert vec_slab.shape == (VEC_ROWS, VEC_LANES), vec_slab.shape
    return {
        "emb_table": emb_table,                        # (96, 32)
        "w_slab": jnp.stack(w_rows, axis=0),           # (L, 32, 192)
        "fo_w": jnp.stack(fo_rows, axis=0),            # (L, 64, 32)
        "cls_w": cls_w,                                # (32, 160)
        "vec_slab": vec_slab,                          # (20, 128)
    }


# ----------------------------------- main -----------------------------------
if __name__ == "__main__":
    root = jax.random.PRNGKey(0)
    pkey, ikey = jax.random.split(root)
    params = init_params(pkey)
    packed = pack_params(params)

    input_ids = jax.random.randint(ikey, (BATCH, SEQ), 2, VOCAB, dtype=jnp.int32)
    input_ids = input_ids.at[1, -2:].set(PAD_ID)            # pad tail of sample 1
    attention_mask = (input_ids != PAD_ID).astype(jnp.int32)

    logits = bert_classifier_forward(packed, input_ids, attention_mask)
    logits = jax.block_until_ready(logits)
    assert logits.shape == (BATCH, NUM_LABELS), logits.shape
    assert bool(jnp.all(jnp.isfinite(logits)))
    print("KERNEL_OK")
</pallas_src>

<mosaic_0001>
module attributes {stable_mosaic.version = 11 : i64} {
  func.func @_fused_forward_kernel(%arg0: i32, %arg1: memref<16x2xi32, #tpu.memory_space<vmem>>, %arg2: memref<64x64xf32, #tpu.memory_space<vmem>>, %arg3: memref<96x32xf32, #tpu.memory_space<vmem>>, %arg4: memref<2x32x192xf32, #tpu.memory_space<vmem>>, %arg5: memref<2x64x32xf32, #tpu.memory_space<vmem>>, %arg6: memref<32x160xf32, #tpu.memory_space<vmem>>, %arg7: memref<20x128xf32, #tpu.memory_space<vmem>>, %arg8: memref<16x128xf32, #tpu.memory_space<vmem>>) attributes {dimension_semantics = [#tpu.dimension_semantics<arbitrary>], iteration_bounds = array<i64: 1>, scalar_prefetch = 0 : i64, scratch_operands = 0 : i64, tpu.core_type = #tpu.core_type<tc>, window_params = [{pipeline_mode = #tpu.pipeline_mode<synchronous>, transform_indices = @transform_0, window_bounds = array<i64: 16, 2>}, {pipeline_mode = #tpu.pipeline_mode<synchronous>, transform_indices = @transform_1, window_bounds = array<i64: 64, 64>}, {pipeline_mode = #tpu.pipeline_mode<synchronous>, transform_indices = @transform_2, window_bounds = array<i64: 96, 32>}, {pipeline_mode = #tpu.pipeline_mode<synchronous>, transform_indices = @transform_3, window_bounds = array<i64: 2, 32, 192>}, {pipeline_mode = #tpu.pipeline_mode<synchronous>, transform_indices = @transform_4, window_bounds = array<i64: 2, 64, 32>}, {pipeline_mode = #tpu.pipeline_mode<synchronous>, transform_indices = @transform_5, window_bounds = array<i64: 32, 160>}, {pipeline_mode = #tpu.pipeline_mode<synchronous>, transform_indices = @transform_6, window_bounds = array<i64: 20, 128>}, {pipeline_mode = #tpu.pipeline_mode<synchronous>, transform_indices = @transform_7, window_bounds = array<i64: 16, 128>}]} {
    %c0 = arith.constant 0 : index
    %c0_0 = arith.constant 0 : index
    %0 = vector.load %arg7[%c0, %c0_0] : memref<20x128xf32, #tpu.memory_space<vmem>>, vector<20x128xf32>
    %c0_1 = arith.constant 0 : index
    %c0_2 = arith.constant 0 : index
    %1 = vector.load %arg1[%c0_1, %c0_2] : memref<16x2xi32, #tpu.memory_space<vmem>>, vector<16x2xi32>
    %2 = tpu.iota {dimensions = array<i32: 1>} : vector<16x96xi32>
    %3 = vector.extract_strided_slice %1 {offsets = [0, 0], sizes = [16, 1], strides = [1, 1]} : vector<16x2xi32> to vector<16x1xi32>
    %4 = vector.broadcast %3 : vector<16x1xi32> to vector<16x96xi32>
    %5 = arith.cmpi eq, %4, %2 : vector<16x96xi32>
    %6 = arith.extui %5 : vector<16x96xi1> to vector<16x96xi32>
    %7 = arith.sitofp %6 : vector<16x96xi32> to vector<16x96xf32>
    %8 = vector.extract_strided_slice %1 {offsets = [0, 1], sizes = [16, 1], strides = [1, 1]} : vector<16x2xi32> to vector<16x1xi32>
    %9 = vector.broadcast %8 : vector<16x1xi32> to vector<16x96xi32>
    %10 = arith.cmpi eq, %9, %2 : vector<16x96xi32>
    %11 = arith.extui %10 : vector<16x96xi1> to vector<16x96xi32>
    %12 = arith.sitofp %11 : vector<16x96xi32> to vector<16x96xf32>
    %13 = arith.addf %7, %12 : vector<16x96xf32>
    %c0_3 = arith.constant 0 : index
    %c0_4 = arith.constant 0 : index
    %14 = vector.load %arg3[%c0_3, %c0_4] : memref<96x32xf32, #tpu.memory_space<vmem>>, vector<96x32xf32>
    %cst = arith.constant dense<0.000000e+00> : vector<16x32xf32>
    %15 = tpu.matmul %13, %14, %cst {dimension_numbers = #tpu.dot_dimension_numbers<[1], [0], [0], [1], [0, 0, 1, 1], [], []>} : vector<16x96xf32>, vector<96x32xf32>, vector<16x32xf32> -> vector<16x32xf32>
    %16 = vector.extract_strided_slice %0 {offsets = [0, 0], sizes = [1, 32], strides = [1, 1]} : vector<20x128xf32> to vector<1x32xf32>
    %17 = vector.extract_strided_slice %0 {offsets = [1, 0], sizes = [1, 32], strides = [1, 1]} : vector<20x128xf32> to vector<1x32xf32>
    %cst_5 = arith.constant dense<0.000000e+00> : vector<16xf32>
    %18 = vector.multi_reduction <add>, %15, %cst_5 [1] : vector<16x32xf32> to vector<16xf32>
    %19 = vector.shape_cast %18 : vector<16xf32> to vector<16x1xf32>
    %cst_6 = arith.constant 3.200000e+01 : f32
    %20 = vector.broadcast %cst_6 : f32 to vector<16x1xf32>
    %21 = arith.divf %19, %20 : vector<16x1xf32>
    %22 = vector.broadcast %21 : vector<16x1xf32> to vector<16x32xf32>
    %23 = arith.subf %15, %22 : vector<16x32xf32>
    %24 = arith.mulf %23, %23 : vector<16x32xf32>
    %cst_7 = arith.constant dense<0.000000e+00> : vector<16xf32>
    %25 = vector.multi_reduction <add>, %24, %cst_7 [1] : vector<16x32xf32> to vector<16xf32>
    %26 = vector.shape_cast %25 : vector<16xf32> to vector<16x1xf32>
    %cst_8 = arith.constant 3.200000e+01 : f32
    %27 = vector.broadcast %cst_8 : f32 to vector<16x1xf32>
    %28 = arith.divf %26, %27 : vector<16x1xf32>
    %29 = vector.broadcast %21 : vector<16x1xf32> to vector<16x32xf32>
    %30 = arith.subf %15, %29 : vector<16x32xf32>
    %cst_9 = arith.constant 9.99999974E-6 : f32
    %31 = vector.broadcast %cst_9 : f32 to vector<16x1xf32>
    %32 = arith.addf %28, %31 : vector<16x1xf32>
    %33 = math.rsqrt %32 : vector<16x1xf32>
    %34 = vector.broadcast %33 : vector<16x1xf32> to vector<16x32xf32>
    %35 = arith.mulf %30, %34 : vector<16x32xf32>
    %36 = vector.broadcast %16 : vector<1x32xf32> to vector<16x32xf32>
    %37 = arith.mulf %35, %36 : vector<16x32xf32>
    %38 = vector.broadcast %17 : vector<1x32xf32> to vector<16x32xf32>
    %39 = arith.addf %37, %38 : vector<16x32xf32>
    %c0_10 = arith.constant 0 : index
    %c0_11 = arith.constant 0 : index
    %40 = vector.load %arg2[%c0_10, %c0_11] : memref<64x64xf32, #tpu.memory_space<vmem>>, vector<64x64xf32>
    %c0_12 = arith.constant 0 : index
    %c0_13 = arith.constant 0 : index
    %c0_14 = arith.constant 0 : index
    %41 = vector.load %arg4[%c0_12, %c0_13, %c0_14] : memref<2x32x192xf32, #tpu.memory_space<vmem>>, vector<1x32x192xf32>
    %42 = vector.shape_cast %41 : vector<1x32x192xf32> to vector<32x192xf32>
    %43 = vector.extract_strided_slice %42 {offsets = [0, 0], sizes = [32, 96], strides = [1, 1]} : vector<32x192xf32> to vector<32x96xf32>
    %44 = vector.extract_strided_slice %42 {offsets = [0, 96], sizes = [32, 32], strides = [1, 1]} : vector<32x192xf32> to vector<32x32xf32>
    %45 = vector.extract_strided_slice %42 {offsets = [0, 128], sizes = [32, 64], strides = [1, 1]} : vector<32x192xf32> to vector<32x64xf32>
    %46 = vector.extract_strided_slice %0 {offsets = [2, 0], sizes = [1, 96], strides = [1, 1]} : vector<20x128xf32> to vector<1x96xf32>
    %47 = vector.extract_strided_slice %0 {offsets = [3, 0], sizes = [1, 32], strides = [1, 1]} : vector<20x128xf32> to vector<1x32xf32>
    %48 = vector.extract_strided_slice %0 {offsets = [4, 0], sizes = [1, 32], strides = [1, 1]} : vector<20x128xf32> to vector<1x32xf32>
    %49 = vector.extract_strided_slice %0 {offsets = [5, 0], sizes = [1, 32], strides = [1, 1]} : vector<20x128xf32> to vector<1x32xf32>
    %50 = vector.extract_strided_slice %0 {offsets = [6, 0], sizes = [1, 64], strides = [1, 1]} : vector<20x128xf32> to vector<1x64xf32>
    %51 = vector.extract_strided_slice %0 {offsets = [7, 0], sizes = [1, 32], strides = [1, 1]} : vector<20x128xf32> to vector<1x32xf32>
    %52 = vector.extract_strided_slice %0 {offsets = [8, 0], sizes = [1, 32], strides = [1, 1]} : vector<20x128xf32> to vector<1x32xf32>
    %53 = vector.extract_strided_slice %0 {offsets = [9, 0], sizes = [1, 32], strides = [1, 1]} : vector<20x128xf32> to vector<1x32xf32>
    %cst_15 = arith.constant dense<0.000000e+00> : vector<16x96xf32>
    %54 = tpu.matmul %39, %43, %cst_15 {dimension_numbers = #tpu.dot_dimension_numbers<[1], [0], [0], [1], [0, 0, 1, 1], [], []>} : vector<16x32xf32>, vector<32x96xf32>, vector<16x96xf32> -> vector<16x96xf32>
    %55 = vector.broadcast %46 : vector<1x96xf32> to vector<16x96xf32>
    %56 = arith.addf %54, %55 : vector<16x96xf32>
    %57 = vector.extract_strided_slice %56 {offsets = [0, 0], sizes = [8, 8], strides = [1, 1]} : vector<16x96xf32> to vector<8x8xf32>
    %58 = vector.extract_strided_slice %56 {offsets = [0, 8], sizes = [8, 8], strides = [1, 1]} : vector<16x96xf32> to vector<8x8xf32>
    %59 = vector.extract_strided_slice %56 {offsets = [0, 16], sizes = [8, 8], strides = [1, 1]} : vector<16x96xf32> to vector<8x8xf32>
    %60 = vector.extract_strided_slice %56 {offsets = [0, 24], sizes = [8, 8], strides = [1, 1]} : vector<16x96xf32> to vector<8x8xf32>
    %61 = vector.extract_strided_slice %56 {offsets = [8, 0], sizes = [8, 8], strides = [1, 1]} : vector<16x96xf32> to vector<8x8xf32>
    %62 = vector.extract_strided_slice %56 {offsets = [8, 8], sizes = [8, 8], strides = [1, 1]} : vector<16x96xf32> to vector<8x8xf32>
    %63 = vector.extract_strided_slice %56 {offsets = [8, 16], sizes = [8, 8], strides = [1, 1]} : vector<16x96xf32> to vector<8x8xf32>
    %64 = vector.extract_strided_slice %56 {offsets = [8, 24], sizes = [8, 8], strides = [1, 1]} : vector<16x96xf32> to vector<8x8xf32>
    %65 = tpu.concatenate %57, %58, %59, %60, %61, %62, %63, %64 in 0 : vector<8x8xf32>, vector<8x8xf32>, vector<8x8xf32>, vector<8x8xf32>, vector<8x8xf32>, vector<8x8xf32>, vector<8x8xf32>, vector<8x8xf32> -> vector<64x8xf32>
    %66 = vector.extract_strided_slice %56 {offsets = [0, 32], sizes = [8, 8], strides = [1, 1]} : vector<16x96xf32> to vector<8x8xf32>
    %67 = vector.extract_strided_slice %56 {offsets = [0, 40], sizes = [8, 8], strides = [1, 1]} : vector<16x96xf32> to vector<8x8xf32>
    %68 = vector.extract_strided_slice %56 {offsets = [0, 48], sizes = [8, 8], strides = [1, 1]} : vector<16x96xf32> to vector<8x8xf32>
    %69 = vector.extract_strided_slice %56 {offsets = [0, 56], sizes = [8, 8], strides = [1, 1]} : vector<16x96xf32> to vector<8x8xf32>
    %70 = vector.extract_strided_slice %56 {offsets = [8, 32], sizes = [8, 8], strides = [1, 1]} : vector<16x96xf32> to vector<8x8xf32>
    %71 = vector.extract_strided_slice %56 {offsets = [8, 40], sizes = [8, 8], strides = [1, 1]} : vector<16x96xf32> to vector<8x8xf32>
    %72 = vector.extract_strided_slice %56 {offsets = [8, 48], sizes = [8, 8], strides = [1, 1]} : vector<16x96xf32> to vector<8x8xf32>
    %73 = vector.extract_strided_slice %56 {offsets = [8, 56], sizes = [8, 8], strides = [1, 1]} : vector<16x96xf32> to vector<8x8xf32>
    %74 = tpu.concatenate %66, %67, %68, %69, %70, %71, %72, %73 in 0 : vector<8x8xf32>, vector<8x8xf32>, vector<8x8xf32>, vector<8x8xf32>, vector<8x8xf32>, vector<8x8xf32>, vector<8x8xf32>, vector<8x8xf32> -> vector<64x8xf32>
    %75 = vector.extract_strided_slice %56 {offsets = [0, 64], sizes = [8, 8], strides = [1, 1]} : vector<16x96xf32> to vector<8x8xf32>
    %76 = vector.extract_strided_slice %56 {offsets = [0, 72], sizes = [8, 8], strides = [1, 1]} : vector<16x96xf32> to vector<8x8xf32>
    %77 = vector.extract_strided_slice %56 {offsets = [0, 80], sizes = [8, 8], strides = [1, 1]} : vector<16x96xf32> to vector<8x8xf32>
    %78 = vector.extract_strided_slice %56 {offsets = [0, 88], sizes = [8, 8], strides = [1, 1]} : vector<16x96xf32> to vector<8x8xf32>
    %79 = vector.extract_strided_slice %56 {offsets = [8, 64], sizes = [8, 8], strides = [1, 1]} : vector<16x96xf32> to vector<8x8xf32>
    %80 = vector.extract_strided_slice %56 {offsets = [8, 72], sizes = [8, 8], strides = [1, 1]} : vector<16x96xf32> to vector<8x8xf32>
    %81 = vector.extract_strided_slice %56 {offsets = [8, 80], sizes = [8, 8], strides = [1, 1]} : vector<16x96xf32> to vector<8x8xf32>
    %82 = vector.extract_strided_slice %56 {offsets = [8, 88], sizes = [8, 8], strides = [1, 1]} : vector<16x96xf32> to vector<8x8xf32>
    %83 = tpu.concatenate %75, %76, %77, %78, %79, %80, %81, %82 in 0 : vector<8x8xf32>, vector<8x8xf32>, vector<8x8xf32>, vector<8x8xf32>, vector<8x8xf32>, vector<8x8xf32>, vector<8x8xf32>, vector<8x8xf32> -> vector<64x8xf32>
    %84 = tpu.transpose %74, [1, 0] : vector<64x8xf32> -> vector<8x64xf32>
    %cst_16 = arith.constant dense<0.000000e+00> : vector<64x64xf32>
    %85 = tpu.matmul %65, %84, %cst_16 {dimension_numbers = #tpu.dot_dimension_numbers<[1], [0], [0], [1], [0, 0, 1, 1], [], []>} : vector<64x8xf32>, vector<8x64xf32>, vector<64x64xf32> -> vector<64x64xf32>
    %86 = arith.addf %85, %40 : vector<64x64xf32>
    %cst_17 = arith.constant dense<0xFF800000> : vector<64xf32>
    %87 = vector.multi_reduction <maximumf>, %86, %cst_17 [1] : vector<64x64xf32> to vector<64xf32>
    %88 = vector.shape_cast %87 : vector<64xf32> to vector<64x1xf32>
    %89 = vector.broadcast %88 : vector<64x1xf32> to vector<64x64xf32>
    %90 = arith.subf %86, %89 : vector<64x64xf32>
    %91 = math.exp %90 : vector<64x64xf32>
    %cst_18 = arith.constant dense<0.000000e+00> : vector<64xf32>
    %92 = vector.multi_reduction <add>, %91, %cst_18 [1] : vector<64x64xf32> to vector<64xf32>
    %93 = vector.shape_cast %92 : vector<64xf32> to vector<64x1xf32>
    %94 = tpu.reciprocal %93 {approx = true} : vector<64x1xf32> -> vector<64x1xf32>
    %95 = vector.broadcast %94 : vector<64x1xf32> to vector<64x64xf32>
    %96 = arith.mulf %91, %95 : vector<64x64xf32>
    %cst_19 = arith.constant dense<0.000000e+00> : vector<64x8xf32>
    %97 = tpu.matmul %96, %83, %cst_19 {dimension_numbers = #tpu.dot_dimension_numbers<[1], [0], [0], [1], [0, 0, 1, 1], [], []>} : vector<64x64xf32>, vector<64x8xf32>, vector<64x8xf32> -> vector<64x8xf32>
    %98 = vector.extract_strided_slice %97 {offsets = [0, 0], sizes = [8, 8], strides = [1, 1]} : vector<64x8xf32> to vector<8x8xf32>
    %99 = vector.extract_strided_slice %97 {offsets = [8, 0], sizes = [8, 8], strides = [1, 1]} : vector<64x8xf32> to vector<8x8xf32>
    %100 = vector.extract_strided_slice %97 {offsets = [16, 0], sizes = [8, 8], strides = [1, 1]} : vector<64x8xf32> to vector<8x8xf32>
    %101 = vector.extract_strided_slice %97 {offsets = [24, 0], sizes = [8, 8], strides = [1, 1]} : vector<64x8xf32> to vector<8x8xf32>
    %102 = tpu.concatenate %98, %99, %100, %101 in 1 : vector<8x8xf32>, vector<8x8xf32>, vector<8x8xf32>, vector<8x8xf32> -> vector<8x32xf32>
    %103 = vector.extract_strided_slice %97 {offsets = [32, 0], sizes = [8, 8], strides = [1, 1]} : vector<64x8xf32> to vector<8x8xf32>
    %104 = vector.extract_strided_slice %97 {offsets = [40, 0], sizes = [8, 8], strides = [1, 1]} : vector<64x8xf32> to vector<8x8xf32>
    %105 = vector.extract_strided_slice %97 {offsets = [48, 0], sizes = [8, 8], strides = [1, 1]} : vector<64x8xf32> to vector<8x8xf32>
    %106 = vector.extract_strided_slice %97 {offsets = [56, 0], sizes = [8, 8], strides = [1, 1]} : vector<64x8xf32> to vector<8x8xf32>
    %107 = tpu.concatenate %103, %104, %105, %106 in 1 : vector<8x8xf32>, vector<8x8xf32>, vector<8x8xf32>, vector<8x8xf32> -> vector<8x32xf32>
    %108 = tpu.concatenate %102, %107 in 0 : vector<8x32xf32>, vector<8x32xf32> -> vector<16x32xf32>
    %cst_20 = arith.constant dense<0.000000e+00> : vector<16x32xf32>
    %109 = tpu.matmul %108, %44, %cst_20 {dimension_numbers = #tpu.dot_dimension_numbers<[1], [0], [0], [1], [0, 0, 1, 1], [], []>} : vector<16x32xf32>, vector<32x32xf32>, vector<16x32xf32> -> vector<16x32xf32>
    %110 = vector.broadcast %47 : vector<1x32xf32> to vector<16x32xf32>
    %111 = arith.addf %109, %110 : vector<16x32xf32>
    %112 = arith.addf %111, %39 : vector<16x32xf32>
    %cst_21 = arith.constant dense<0.000000e+00> : vector<16xf32>
    %113 = vector.multi_reduction <add>, %112, %cst_21 [1] : vector<16x32xf32> to vector<16xf32>
    %114 = vector.shape_cast %113 : vector<16xf32> to vector<16x1xf32>
    %cst_22 = arith.constant 3.200000e+01 : f32
    %115 = vector.broadcast %cst_22 : f32 to vector<16x1xf32>
    %116 = arith.divf %114, %115 : vector<16x1xf32>
    %117 = vector.broadcast %116 : vector<16x1xf32> to vector<16x32xf32>
    %118 = arith.subf %112, %117 : vector<16x32xf32>
    %119 = arith.mulf %118, %118 : vector<16x32xf32>
    %cst_23 = arith.constant dense<0.000000e+00> : vector<16xf32>
    %120 = vector.multi_reduction <add>, %119, %cst_23 [1] : vector<16x32xf32> to vector<16xf32>
    %121 = vector.shape_cast %120 : vector<16xf32> to vector<16x1xf32>
    %cst_24 = arith.constant 3.200000e+01 : f32
    %122 = vector.broadcast %cst_24 : f32 to vector<16x1xf32>
    %123 = arith.divf %121, %122 : vector<16x1xf32>
    %124 = vector.broadcast %116 : vector<16x1xf32> to vector<16x32xf32>
    %125 = arith.subf %112, %124 : vector<16x32xf32>
    %cst_25 = arith.constant 9.99999974E-6 : f32
    %126 = vector.broadcast %cst_25 : f32 to vector<16x1xf32>
    %127 = arith.addf %123, %126 : vector<16x1xf32>
    %128 = math.rsqrt %127 : vector<16x1xf32>
    %129 = vector.broadcast %128 : vector<16x1xf32> to vector<16x32xf32>
    %130 = arith.mulf %125, %129 : vector<16x32xf32>
    %131 = vector.broadcast %48 : vector<1x32xf32> to vector<16x32xf32>
    %132 = arith.mulf %130, %131 : vector<16x32xf32>
    %133 = vector.broadcast %49 : vector<1x32xf32> to vector<16x32xf32>
    %134 = arith.addf %132, %133 : vector<16x32xf32>
    %cst_26 = arith.constant dense<0.000000e+00> : vector<16x64xf32>
    %135 = tpu.matmul %134, %45, %cst_26 {dimension_numbers = #tpu.dot_dimension_numbers<[1], [0], [0], [1], [0, 0, 1, 1], [], []>} : vector<16x32xf32>, vector<32x64xf32>, vector<16x64xf32> -> vector<16x64xf32>
    %136 = vector.broadcast %50 : vector<1x64xf32> to vector<16x64xf32>
    %137 = arith.addf %135, %136 : vector<16x64xf32>
    %138 = arith.mulf %137, %137 : vector<16x64xf32>
    %139 = arith.mulf %137, %138 : vector<16x64xf32>
    %cst_27 = arith.constant 4.471500e-02 : f32
    %140 = vector.broadcast %cst_27 : f32 to vector<16x64xf32>
    %141 = arith.mulf %140, %139 : vector<16x64xf32>
    %142 = arith.addf %137, %141 : vector<16x64xf32>
    %cst_28 = arith.constant 0.797884583 : f32
    %143 = vector.broadcast %cst_28 : f32 to vector<16x64xf32>
    %144 = arith.mulf %143, %142 : vector<16x64xf32>
    %145 = math.tanh %144 : vector<16x64xf32>
    %cst_29 = arith.constant 1.000000e+00 : f32
    %146 = vector.broadcast %cst_29 : f32 to vector<16x64xf32>
    %147 = arith.addf %146, %145 : vector<16x64xf32>
    %cst_30 = arith.constant 5.000000e-01 : f32
    %148 = vector.broadcast %cst_30 : f32 to vector<16x64xf32>
    %149 = arith.mulf %148, %147 : vector<16x64xf32>
    %150 = arith.mulf %137, %149 : vector<16x64xf32>
    %c0_31 = arith.constant 0 : index
    %c0_32 = arith.constant 0 : index
    %c0_33 = arith.constant 0 : index
    %151 = vector.load %arg5[%c0_31, %c0_32, %c0_33] : memref<2x64x32xf32, #tpu.memory_space<vmem>>, vector<1x64x32xf32>
    %152 = vector.shape_cast %151 : vector<1x64x32xf32> to vector<64x32xf32>
    %cst_34 = arith.constant dense<0.000000e+00> : vector<16x32xf32>
    %153 = tpu.matmul %150, %152, %cst_34 {dimension_numbers = #tpu.dot_dimension_numbers<[1], [0], [0], [1], [0, 0, 1, 1], [], []>} : vector<16x64xf32>, vector<64x32xf32>, vector<16x32xf32> -> vector<16x32xf32>
    %154 = vector.broadcast %51 : vector<1x32xf32> to vector<16x32xf32>
    %155 = arith.addf %153, %154 : vector<16x32xf32>
    %156 = arith.addf %155, %134 : vector<16x32xf32>
    %cst_35 = arith.constant dense<0.000000e+00> : vector<16xf32>
    %157 = vector.multi_reduction <add>, %156, %cst_35 [1] : vector<16x32xf32> to vector<16xf32>
    %158 = vector.shape_cast %157 : vector<16xf32> to vector<16x1xf32>
    %cst_36 = arith.constant 3.200000e+01 : f32
    %159 = vector.broadcast %cst_36 : f32 to vector<16x1xf32>
    %160 = arith.divf %158, %159 : vector<16x1xf32>
    %161 = vector.broadcast %160 : vector<16x1xf32> to vector<16x32xf32>
    %162 = arith.subf %156, %161 : vector<16x32xf32>
    %163 = arith.mulf %162, %162 : vector<16x32xf32>
    %cst_37 = arith.constant dense<0.000000e+00> : vector<16xf32>
    %164 = vector.multi_reduction <add>, %163, %cst_37 [1] : vector<16x32xf32> to vector<16xf32>
    %165 = vector.shape_cast %164 : vector<16xf32> to vector<16x1xf32>
    %cst_38 = arith.constant 3.200000e+01 : f32
    %166 = vector.broadcast %cst_38 : f32 to vector<16x1xf32>
    %167 = arith.divf %165, %166 : vector<16x1xf32>
    %168 = vector.broadcast %160 : vector<16x1xf32> to vector<16x32xf32>
    %169 = arith.subf %156, %168 : vector<16x32xf32>
    %cst_39 = arith.constant 9.99999974E-6 : f32
    %170 = vector.broadcast %cst_39 : f32 to vector<16x1xf32>
    %171 = arith.addf %167, %170 : vector<16x1xf32>
    %172 = math.rsqrt %171 : vector<16x1xf32>
    %173 = vector.broadcast %172 : vector<16x1xf32> to vector<16x32xf32>
    %174 = arith.mulf %169, %173 : vector<16x32xf32>
    %175 = vector.broadcast %52 : vector<1x32xf32> to vector<16x32xf32>
    %176 = arith.mulf %174, %175 : vector<16x32xf32>
    %177 = vector.broadcast %53 : vector<1x32xf32> to vector<16x32xf32>
    %178 = arith.addf %176, %177 : vector<16x32xf32>
    %c1 = arith.constant 1 : index
    %c0_40 = arith.constant 0 : index
    %c0_41 = arith.constant 0 : index
    %179 = vector.load %arg4[%c1, %c0_40, %c0_41] : memref<2x32x192xf32, #tpu.memory_space<vmem>>, vector<1x32x192xf32>
    %180 = vector.shape_cast %179 : vector<1x32x192xf32> to vector<32x192xf32>
    %181 = vector.extract_strided_slice %180 {offsets = [0, 0], sizes = [32, 96], strides = [1, 1]} : vector<32x192xf32> to vector<32x96xf32>
    %182 = vector.extract_strided_slice %180 {offsets = [0, 96], sizes = [32, 32], strides = [1, 1]} : vector<32x192xf32> to vector<32x32xf32>
    %183 = vector.extract_strided_slice %180 {offsets = [0, 128], sizes = [32, 64], strides = [1, 1]} : vector<32x192xf32> to vector<32x64xf32>
    %184 = vector.extract_strided_slice %0 {offsets = [10, 0], sizes = [1, 96], strides = [1, 1]} : vector<20x128xf32> to vector<1x96xf32>
    %185 = vector.extract_strided_slice %0 {offsets = [11, 0], sizes = [1, 32], strides = [1, 1]} : vector<20x128xf32> to vector<1x32xf32>
    %186 = vector.extract_strided_slice %0 {offsets = [12, 0], sizes = [1, 32], strides = [1, 1]} : vector<20x128xf32> to vector<1x32xf32>
    %187 = vector.extract_strided_slice %0 {offsets = [13, 0], sizes = [1, 32], strides = [1, 1]} : vector<20x128xf32> to vector<1x32xf32>
    %188 = vector.extract_strided_slice %0 {offsets = [14, 0], sizes = [1, 64], strides = [1, 1]} : vector<20x128xf32> to vector<1x64xf32>
    %189 = vector.extract_strided_slice %0 {offsets = [15, 0], sizes = [1, 32], strides = [1, 1]} : vector<20x128xf32> to vector<1x32xf32>
    %190 = vector.extract_strided_slice %0 {offsets = [16, 0], sizes = [1, 32], strides = [1, 1]} : vector<20x128xf32> to vector<1x32xf32>
    %191 = vector.extract_strided_slice %0 {offsets = [17, 0], sizes = [1, 32], strides = [1, 1]} : vector<20x128xf32> to vector<1x32xf32>
    %cst_42 = arith.constant dense<0.000000e+00> : vector<16x96xf32>
    %192 = tpu.matmul %178, %181, %cst_42 {dimension_numbers = #tpu.dot_dimension_numbers<[1], [0], [0], [1], [0, 0, 1, 1], [], []>} : vector<16x32xf32>, vector<32x96xf32>, vector<16x96xf32> -> vector<16x96xf32>
    %193 = vector.broadcast %184 : vector<1x96xf32> to vector<16x96xf32>
    %194 = arith.addf %192, %193 : vector<16x96xf32>
    %195 = vector.extract_strided_slice %194 {offsets = [0, 0], sizes = [8, 8], strides = [1, 1]} : vector<16x96xf32> to vector<8x8xf32>
    %196 = vector.extract_strided_slice %194 {offsets = [0, 8], sizes = [8, 8], strides = [1, 1]} : vector<16x96xf32> to vector<8x8xf32>
    %197 = vector.extract_strided_slice %194 {offsets = [0, 16], sizes = [8, 8], strides = [1, 1]} : vector<16x96xf32> to vector<8x8xf32>
    %198 = vector.extract_strided_slice %194 {offsets = [0, 24], sizes = [8, 8], strides = [1, 1]} : vector<16x96xf32> to vector<8x8xf32>
    %199 = vector.extract_strided_slice %194 {offsets = [8, 0], sizes = [8, 8], strides = [1, 1]} : vector<16x96xf32> to vector<8x8xf32>
    %200 = vector.extract_strided_slice %194 {offsets = [8, 8], sizes = [8, 8], strides = [1, 1]} : vector<16x96xf32> to vector<8x8xf32>
    %201 = vector.extract_strided_slice %194 {offsets = [8, 16], sizes = [8, 8], strides = [1, 1]} : vector<16x96xf32> to vector<8x8xf32>
    %202 = vector.extract_strided_slice %194 {offsets = [8, 24], sizes = [8, 8], strides = [1, 1]} : vector<16x96xf32> to vector<8x8xf32>
    %203 = tpu.concatenate %195, %196, %197, %198, %199, %200, %201, %202 in 0 : vector<8x8xf32>, vector<8x8xf32>, vector<8x8xf32>, vector<8x8xf32>, vector<8x8xf32>, vector<8x8xf32>, vector<8x8xf32>, vector<8x8xf32> -> vector<64x8xf32>
    %204 = vector.extract_strided_slice %194 {offsets = [0, 32], sizes = [8, 8], strides = [1, 1]} : vector<16x96xf32> to vector<8x8xf32>
    %205 = vector.extract_strided_slice %194 {offsets = [0, 40], sizes = [8, 8], strides = [1, 1]} : vector<16x96xf32> to vector<8x8xf32>
    %206 = vector.extract_strided_slice %194 {offsets = [0, 48], sizes = [8, 8], strides = [1, 1]} : vector<16x96xf32> to vector<8x8xf32>
    %207 = vector.extract_strided_slice %194 {offsets = [0, 56], sizes = [8, 8], strides = [1, 1]} : vector<16x96xf32> to vector<8x8xf32>
    %208 = vector.extract_strided_slice %194 {offsets = [8, 32], sizes = [8, 8], strides = [1, 1]} : vector<16x96xf32> to vector<8x8xf32>
    %209 = vector.extract_strided_slice %194 {offsets = [8, 40], sizes = [8, 8], strides = [1, 1]} : vector<16x96xf32> to vector<8x8xf32>
    %210 = vector.extract_strided_slice %194 {offsets = [8, 48], sizes = [8, 8], strides = [1, 1]} : vector<16x96xf32> to vector<8x8xf32>
    %211 = vector.extract_strided_slice %194 {offsets = [8, 56], sizes = [8, 8], strides = [1, 1]} : vector<16x96xf32> to vector<8x8xf32>
    %212 = tpu.concatenate %204, %205, %206, %207, %208, %209, %210, %211 in 0 : vector<8x8xf32>, vector<8x8xf32>, vector<8x8xf32>, vector<8x8xf32>, vector<8x8xf32>, vector<8x8xf32>, vector<8x8xf32>, vector<8x8xf32> -> vector<64x8xf32>
    %213 = vector.extract_strided_slice %194 {offsets = [0, 64], sizes = [8, 8], strides = [1, 1]} : vector<16x96xf32> to vector<8x8xf32>
    %214 = vector.extract_strided_slice %194 {offsets = [0, 72], sizes = [8, 8], strides = [1, 1]} : vector<16x96xf32> to vector<8x8xf32>
    %215 = vector.extract_strided_slice %194 {offsets = [0, 80], sizes = [8, 8], strides = [1, 1]} : vector<16x96xf32> to vector<8x8xf32>
    %216 = vector.extract_strided_slice %194 {offsets = [0, 88], sizes = [8, 8], strides = [1, 1]} : vector<16x96xf32> to vector<8x8xf32>
    %217 = vector.extract_strided_slice %194 {offsets = [8, 64], sizes = [8, 8], strides = [1, 1]} : vector<16x96xf32> to vector<8x8xf32>
    %218 = vector.extract_strided_slice %194 {offsets = [8, 72], sizes = [8, 8], strides = [1, 1]} : vector<16x96xf32> to vector<8x8xf32>
    %219 = vector.extract_strided_slice %194 {offsets = [8, 80], sizes = [8, 8], strides = [1, 1]} : vector<16x96xf32> to vector<8x8xf32>
    %220 = vector.extract_strided_slice %194 {offsets = [8, 88], sizes = [8, 8], strides = [1, 1]} : vector<16x96xf32> to vector<8x8xf32>
    %221 = tpu.concatenate %213, %214, %215, %216, %217, %218, %219, %220 in 0 : vector<8x8xf32>, vector<8x8xf32>, vector<8x8xf32>, vector<8x8xf32>, vector<8x8xf32>, vector<8x8xf32>, vector<8x8xf32>, vector<8x8xf32> -> vector<64x8xf32>
    %222 = tpu.transpose %212, [1, 0] : vector<64x8xf32> -> vector<8x64xf32>
    %cst_43 = arith.constant dense<0.000000e+00> : vector<64x64xf32>
    %223 = tpu.matmul %203, %222, %cst_43 {dimension_numbers = #tpu.dot_dimension_numbers<[1], [0], [0], [1], [0, 0, 1, 1], [], []>} : vector<64x8xf32>, vector<8x64xf32>, vector<64x64xf32> -> vector<64x64xf32>
    %224 = arith.addf %223, %40 : vector<64x64xf32>
    %cst_44 = arith.constant dense<0xFF800000> : vector<64xf32>
    %225 = vector.multi_reduction <maximumf>, %224, %cst_44 [1] : vector<64x64xf32> to vector<64xf32>
    %226 = vector.shape_cast %225 : vector<64xf32> to vector<64x1xf32>
    %227 = vector.broadcast %226 : vector<64x1xf32> to vector<64x64xf32>
    %228 = arith.subf %224, %227 : vector<64x64xf32>
    %229 = math.exp %228 : vector<64x64xf32>
    %cst_45 = arith.constant dense<0.000000e+00> : vector<64xf32>
    %230 = vector.multi_reduction <add>, %229, %cst_45 [1] : vector<64x64xf32> to vector<64xf32>
    %231 = vector.shape_cast %230 : vector<64xf32> to vector<64x1xf32>
    %232 = tpu.reciprocal %231 {approx = true} : vector<64x1xf32> -> vector<64x1xf32>
    %233 = vector.broadcast %232 : vector<64x1xf32> to vector<64x64xf32>
    %234 = arith.mulf %229, %233 : vector<64x64xf32>
    %cst_46 = arith.constant dense<0.000000e+00> : vector<64x8xf32>
    %235 = tpu.matmul %234, %221, %cst_46 {dimension_numbers = #tpu.dot_dimension_numbers<[1], [0], [0], [1], [0, 0, 1, 1], [], []>} : vector<64x64xf32>, vector<64x8xf32>, vector<64x8xf32> -> vector<64x8xf32>
    %236 = vector.extract_strided_slice %235 {offsets = [0, 0], sizes = [8, 8], strides = [1, 1]} : vector<64x8xf32> to vector<8x8xf32>
    %237 = vector.extract_strided_slice %235 {offsets = [8, 0], sizes = [8, 8], strides = [1, 1]} : vector<64x8xf32> to vector<8x8xf32>
    %238 = vector.extract_strided_slice %235 {offsets = [16, 0], sizes = [8, 8], strides = [1, 1]} : vector<64x8xf32> to vector<8x8xf32>
    %239 = vector.extract_strided_slice %235 {offsets = [24, 0], sizes = [8, 8], strides = [1, 1]} : vector<64x8xf32> to vector<8x8xf32>
    %240 = tpu.concatenate %236, %237, %238, %239 in 1 : vector<8x8xf32>, vector<8x8xf32>, vector<8x8xf32>, vector<8x8xf32> -> vector<8x32xf32>
    %241 = vector.extract_strided_slice %235 {offsets = [32, 0], sizes = [8, 8], strides = [1, 1]} : vector<64x8xf32> to vector<8x8xf32>
    %242 = vector.extract_strided_slice %235 {offsets = [40, 0], sizes = [8, 8], strides = [1, 1]} : vector<64x8xf32> to vector<8x8xf32>
    %243 = vector.extract_strided_slice %235 {offsets = [48, 0], sizes = [8, 8], strides = [1, 1]} : vector<64x8xf32> to vector<8x8xf32>
    %244 = vector.extract_strided_slice %235 {offsets = [56, 0], sizes = [8, 8], strides = [1, 1]} : vector<64x8xf32> to vector<8x8xf32>
    %245 = tpu.concatenate %241, %242, %243, %244 in 1 : vector<8x8xf32>, vector<8x8xf32>, vector<8x8xf32>, vector<8x8xf32> -> vector<8x32xf32>
    %246 = tpu.concatenate %240, %245 in 0 : vector<8x32xf32>, vector<8x32xf32> -> vector<16x32xf32>
    %cst_47 = arith.constant dense<0.000000e+00> : vector<16x32xf32>
    %247 = tpu.matmul %246, %182, %cst_47 {dimension_numbers = #tpu.dot_dimension_numbers<[1], [0], [0], [1], [0, 0, 1, 1], [], []>} : vector<16x32xf32>, vector<32x32xf32>, vector<16x32xf32> -> vector<16x32xf32>
    %248 = vector.broadcast %185 : vector<1x32xf32> to vector<16x32xf32>
    %249 = arith.addf %247, %248 : vector<16x32xf32>
    %250 = arith.addf %249, %178 : vector<16x32xf32>
    %cst_48 = arith.constant dense<0.000000e+00> : vector<16xf32>
    %251 = vector.multi_reduction <add>, %250, %cst_48 [1] : vector<16x32xf32> to vector<16xf32>
    %252 = vector.shape_cast %251 : vector<16xf32> to vector<16x1xf32>
    %cst_49 = arith.constant 3.200000e+01 : f32
    %253 = vector.broadcast %cst_49 : f32 to vector<16x1xf32>
    %254 = arith.divf %252, %253 : vector<16x1xf32>
    %255 = vector.broadcast %254 : vector<16x1xf32> to vector<16x32xf32>
    %256 = arith.subf %250, %255 : vector<16x32xf32>
    %257 = arith.mulf %256, %256 : vector<16x32xf32>
    %cst_50 = arith.constant dense<0.000000e+00> : vector<16xf32>
    %258 = vector.multi_reduction <add>, %257, %cst_50 [1] : vector<16x32xf32> to vector<16xf32>
    %259 = vector.shape_cast %258 : vector<16xf32> to vector<16x1xf32>
    %cst_51 = arith.constant 3.200000e+01 : f32
    %260 = vector.broadcast %cst_51 : f32 to vector<16x1xf32>
    %261 = arith.divf %259, %260 : vector<16x1xf32>
    %262 = vector.broadcast %254 : vector<16x1xf32> to vector<16x32xf32>
    %263 = arith.subf %250, %262 : vector<16x32xf32>
    %cst_52 = arith.constant 9.99999974E-6 : f32
    %264 = vector.broadcast %cst_52 : f32 to vector<16x1xf32>
    %265 = arith.addf %261, %264 : vector<16x1xf32>
    %266 = math.rsqrt %265 : vector<16x1xf32>
    %267 = vector.broadcast %266 : vector<16x1xf32> to vector<16x32xf32>
    %268 = arith.mulf %263, %267 : vector<16x32xf32>
    %269 = vector.broadcast %186 : vector<1x32xf32> to vector<16x32xf32>
    %270 = arith.mulf %268, %269 : vector<16x32xf32>
    %271 = vector.broadcast %187 : vector<1x32xf32> to vector<16x32xf32>
    %272 = arith.addf %270, %271 : vector<16x32xf32>
    %cst_53 = arith.constant dense<0.000000e+00> : vector<16x64xf32>
    %273 = tpu.matmul %272, %183, %cst_53 {dimension_numbers = #tpu.dot_dimension_numbers<[1], [0], [0], [1], [0, 0, 1, 1], [], []>} : vector<16x32xf32>, vector<32x64xf32>, vector<16x64xf32> -> vector<16x64xf32>
    %274 = vector.broadcast %188 : vector<1x64xf32> to vector<16x64xf32>
    %275 = arith.addf %273, %274 : vector<16x64xf32>
    %276 = arith.mulf %275, %275 : vector<16x64xf32>
    %277 = arith.mulf %275, %276 : vector<16x64xf32>
    %cst_54 = arith.constant 4.471500e-02 : f32
    %278 = vector.broadcast %cst_54 : f32 to vector<16x64xf32>
    %279 = arith.mulf %278, %277 : vector<16x64xf32>
    %280 = arith.addf %275, %279 : vector<16x64xf32>
    %cst_55 = arith.constant 0.797884583 : f32
    %281 = vector.broadcast %cst_55 : f32 to vector<16x64xf32>
    %282 = arith.mulf %281, %280 : vector<16x64xf32>
    %283 = math.tanh %282 : vector<16x64xf32>
    %cst_56 = arith.constant 1.000000e+00 : f32
    %284 = vector.broadcast %cst_56 : f32 to vector<16x64xf32>
    %285 = arith.addf %284, %283 : vector<16x64xf32>
    %cst_57 = arith.constant 5.000000e-01 : f32
    %286 = vector.broadcast %cst_57 : f32 to vector<16x64xf32>
    %287 = arith.mulf %286, %285 : vector<16x64xf32>
    %288 = arith.mulf %275, %287 : vector<16x64xf32>
    %c1_58 = arith.constant 1 : index
    %c0_59 = arith.constant 0 : index
    %c0_60 = arith.constant 0 : index
    %289 = vector.load %arg5[%c1_58, %c0_59, %c0_60] : memref<2x64x32xf32, #tpu.memory_space<vmem>>, vector<1x64x32xf32>
    %290 = vector.shape_cast %289 : vector<1x64x32xf32> to vector<64x32xf32>
    %cst_61 = arith.constant dense<0.000000e+00> : vector<16x32xf32>
    %291 = tpu.matmul %288, %290, %cst_61 {dimension_numbers = #tpu.dot_dimension_numbers<[1], [0], [0], [1], [0, 0, 1, 1], [], []>} : vector<16x64xf32>, vector<64x32xf32>, vector<16x32xf32> -> vector<16x32xf32>
    %292 = vector.broadcast %189 : vector<1x32xf32> to vector<16x32xf32>
    %293 = arith.addf %291, %292 : vector<16x32xf32>
    %294 = arith.addf %293, %272 : vector<16x32xf32>
    %cst_62 = arith.constant dense<0.000000e+00> : vector<16xf32>
    %295 = vector.multi_reduction <add>, %294, %cst_62 [1] : vector<16x32xf32> to vector<16xf32>
    %296 = vector.shape_cast %295 : vector<16xf32> to vector<16x1xf32>
    %cst_63 = arith.constant 3.200000e+01 : f32
    %297 = vector.broadcast %cst_63 : f32 to vector<16x1xf32>
    %298 = arith.divf %296, %297 : vector<16x1xf32>
    %299 = vector.broadcast %298 : vector<16x1xf32> to vector<16x32xf32>
    %300 = arith.subf %294, %299 : vector<16x32xf32>
    %301 = arith.mulf %300, %300 : vector<16x32xf32>
    %cst_64 = arith.constant dense<0.000000e+00> : vector<16xf32>
    %302 = vector.multi_reduction <add>, %301, %cst_64 [1] : vector<16x32xf32> to vector<16xf32>
    %303 = vector.shape_cast %302 : vector<16xf32> to vector<16x1xf32>
    %cst_65 = arith.constant 3.200000e+01 : f32
    %304 = vector.broadcast %cst_65 : f32 to vector<16x1xf32>
    %305 = arith.divf %303, %304 : vector<16x1xf32>
    %306 = vector.broadcast %298 : vector<16x1xf32> to vector<16x32xf32>
    %307 = arith.subf %294, %306 : vector<16x32xf32>
    %cst_66 = arith.constant 9.99999974E-6 : f32
    %308 = vector.broadcast %cst_66 : f32 to vector<16x1xf32>
    %309 = arith.addf %305, %308 : vector<16x1xf32>
    %310 = math.rsqrt %309 : vector<16x1xf32>
    %311 = vector.broadcast %310 : vector<16x1xf32> to vector<16x32xf32>
    %312 = arith.mulf %307, %311 : vector<16x32xf32>
    %313 = vector.broadcast %190 : vector<1x32xf32> to vector<16x32xf32>
    %314 = arith.mulf %312, %313 : vector<16x32xf32>
    %315 = vector.broadcast %191 : vector<1x32xf32> to vector<16x32xf32>
    %316 = arith.addf %314, %315 : vector<16x32xf32>
    %c0_67 = arith.constant 0 : index
    %c0_68 = arith.constant 0 : index
    %317 = vector.load %arg6[%c0_67, %c0_68] : memref<32x160xf32, #tpu.memory_space<vmem>>, vector<32x32xf32>
    %c0_69 = arith.constant 0 : index
    %c32 = arith.constant 32 : index
    %318 = vector.load %arg6[%c0_69, %c32] : memref<32x160xf32, #tpu.memory_space<vmem>>, vector<32x128xf32>
    %cst_70 = arith.constant dense<0.000000e+00> : vector<16x32xf32>
    %319 = tpu.matmul %316, %317, %cst_70 {dimension_numbers = #tpu.dot_dimension_numbers<[1], [0], [0], [1], [0, 0, 1, 1], [], []>} : vector<16x32xf32>, vector<32x32xf32>, vector<16x32xf32> -> vector<16x32xf32>
    %320 = vector.extract_strided_slice %0 {offsets = [18, 0], sizes = [1, 32], strides = [1, 1]} : vector<20x128xf32> to vector<1x32xf32>
    %321 = vector.broadcast %320 : vector<1x32xf32> to vector<16x32xf32>
    %322 = arith.addf %319, %321 : vector<16x32xf32>
    %323 = math.tanh %322 : vector<16x32xf32>
    %cst_71 = arith.constant dense<0.000000e+00> : vector<16x128xf32>
    %324 = tpu.matmul %323, %318, %cst_71 {dimension_numbers = #tpu.dot_dimension_numbers<[1], [0], [0], [1], [0, 0, 1, 1], [], []>} : vector<16x32xf32>, vector<32x128xf32>, vector<16x128xf32> -> vector<16x128xf32>
    %325 = vector.extract_strided_slice %0 {offsets = [19, 0], sizes = [1, 128], strides = [1, 1]} : vector<20x128xf32> to vector<1x128xf32>
    %326 = vector.broadcast %325 : vector<1x128xf32> to vector<16x128xf32>
    %327 = arith.addf %324, %326 : vector<16x128xf32>
    %c0_72 = arith.constant 0 : index
    %c0_73 = arith.constant 0 : index
    %328 = vector.load %arg8[%c0_72, %c0_73] : memref<16x128xf32, #tpu.memory_space<vmem>>, vector<16x128xf32>
    tpu.vector_store %arg8[%c0_72, %c0_73], %327 {strides = array<i32>} : memref<16x128xf32, #tpu.memory_space<vmem>>, vector<16x128xf32>,
    return
  }
  func.func @transform_0(%arg0: i32) -> (i32, i32) {
    %c0_i32 = arith.constant 0 : i32
    %c0_i32_0 = arith.constant 0 : i32
    %c0_i32_1 = arith.constant 0 : i32
    return %c0_i32, %c0_i32_0 : i32, i32
  }
  func.func @transform_1(%arg0: i32) -> (i32, i32) {
    %c0_i32 = arith.constant 0 : i32
    %c0_i32_0 = arith.constant 0 : i32
    %c0_i32_1 = arith.constant 0 : i32
    return %c0_i32, %c0_i32_0 : i32, i32
  }
  func.func @transform_2(%arg0: i32) -> (i32, i32) {
    %c0_i32 = arith.constant 0 : i32
    %c0_i32_0 = arith.constant 0 : i32
    %c0_i32_1 = arith.constant 0 : i32
    return %c0_i32, %c0_i32_0 : i32, i32
  }
  func.func @transform_3(%arg0: i32) -> (i32, i32, i32) {
    %c0_i32 = arith.constant 0 : i32
    %c0_i32_0 = arith.constant 0 : i32
    %c0_i32_1 = arith.constant 0 : i32
    %c0_i32_2 = arith.constant 0 : i32
    return %c0_i32, %c0_i32_0, %c0_i32_1 : i32, i32, i32
  }
  func.func @transform_4(%arg0: i32) -> (i32, i32, i32) {
    %c0_i32 = arith.constant 0 : i32
    %c0_i32_0 = arith.constant 0 : i32
    %c0_i32_1 = arith.constant 0 : i32
    %c0_i32_2 = arith.constant 0 : i32
    return %c0_i32, %c0_i32_0, %c0_i32_1 : i32, i32, i32
  }
  func.func @transform_5(%arg0: i32) -> (i32, i32) {
    %c0_i32 = arith.constant 0 : i32
    %c0_i32_0 = arith.constant 0 : i32
    %c0_i32_1 = arith.constant 0 : i32
    return %c0_i32, %c0_i32_0 : i32, i32
  }
  func.func @transform_6(%arg0: i32) -> (i32, i32) {
    %c0_i32 = arith.constant 0 : i32
    %c0_i32_0 = arith.constant 0 : i32
    %c0_i32_1 = arith.constant 0 : i32
    return %c0_i32, %c0_i32_0 : i32, i32
  }
  func.func @transform_7(%arg0: i32) -> (i32, i32) {
    %c0_i32 = arith.constant 0 : i32
    %c0_i32_0 = arith.constant 0 : i32
    %c0_i32_1 = arith.constant 0 : i32
    return %c0_i32, %c0_i32_0 : i32, i32
  }
}

</mosaic_0001>

<bundles_post_ra>
// kernel: bert_classifier_forward.1
= control target key start
LH: loop header
LB: loop body
LE: loop exit
PB: predicated region body
PF: predicated region fallthrough
CT: control target
= control target key end

     0   :  { %v1734_v0 = vmov 0   ;;  %v1735_v8 = vmov 1   ;;  %v31_v16 = vlaneseq  ;;  %v1736_v21 = vmov 0.0   ;;  %s1738_s13 = smov 112   ;;  %s1739_s14 = smov 104   ;;  %s2463_s0 = inlined_call_operand.vmem [shape: s32[16,2], index: 0, kind: input, shape index: {}]   ;;  %s2464_s2 = inlined_call_operand.vmem [shape: f32[96,32], index: 2, kind: input, shape index: {}]   ;;  %s2465_s3 = inlined_call_operand.vmem [shape: f32[2,32,192], index: 3, kind: input, shape index: {}]   ;;  %s2466_s6 = inlined_call_operand.vmem [shape: f32[20,128], index: 6, kind: input, shape index: {}]   ;;  %s2467_s1 = inlined_call_operand.vmem [shape: f32[64,64], index: 1, kind: input, shape index: {}]   ;;  %s2468_s4 = inlined_call_operand.vmem [shape: f32[2,64,32], index: 4, kind: input, shape index: {}]   ;;  %s2469_s5 = inlined_call_operand.vmem [shape: f32[32,160], index: 5, kind: input, shape index: {}]   ;;  %s2470_s7 = inlined_call_operand.vmem [shape: f32[16,128], index: 7, kind: output, shape index: {}]  }
   0x1   :  { %1554 = vset.pattern.permute.xlu1 %v1734_v0  ;;  %1552 = vset.pattern.permute.xlu0 %v1734_v0  ;;  %v30_v1 = vld [vmem:[%s2463_s0 + $0x8] sm:$0xff]  ;;  %v29_v2 = vld [vmem:[%s2463_s0] sm:$0xff]  ;;  %v70_v3 = vld [vmem:[%s2464_s2 + $0x58] sm:$0xff]  ;;  %vm71_vm2 = vcmask 785408   ;;  %vm101_vm5 = vcmask 261120   ;;  %v1737_v33 = vmov 32.0  }
   0x2   :  { %37 = vperm.xlu1 %1554, %v30_v1   ;;  %34 = vperm.xlu0 %1552, %v29_v2   ;;  %v69_v4 = vld [vmem:[%s2464_s2 + $0x50] sm:$0xff]  ;;  %v68_v5 = vld [vmem:[%s2464_s2 + $0x48] sm:$0xff]  ;;  %v67_v6 = vld [vmem:[%s2464_s2 + $0x40] sm:$0xff]  ;;  %v32_v19 = vand.u32 127, %v31_v16  ;;  %1636 = vrcp.f32 %v1737_v33  ;;  %s1740_s15 = smov 120   ;;  %s1741_s16 = smov 96  }
   0x3   :  { %82 = vmatpush.msra.mxu0 %v70_v3  ;;  %v66_v7 = vld [vmem:[%s2464_s2 + $0x38] sm:$0xff]  ;;  %v65_v9 = vld [vmem:[%s2464_s2 + $0x30] sm:$0xff]  ;;  %v64_v10 = vld [vmem:[%s2464_s2 + $0x28] sm:$0xff]  ;;  %vm235_vm13 = vcmask 64512   ;;  %vm309_vm14 = vcmask 523264   ;;  %s1742_s23 = smov 64  }
   0x4   :  { %v63_v11 = vld [vmem:[%s2464_s2 + $0x20] sm:$0xff]  ;;  %v62_v12 = vld [vmem:[%s2464_s2 + $0x18] sm:$0xff]  ;;  %v61_v13 = vld [vmem:[%s2464_s2 + $0x10] sm:$0xff]  ;;  %s1744_s10 = smov 8   ;;  %s1745_s11 = smov 16   ;;  %vm500_vm15 = vcmask 130048  }
   0x5   :  { %83 = vmatpush.msra.mxu0 %v69_v4  ;;  %v60_v14 = vld [vmem:[%s2464_s2 + $0x8] sm:$0xff]  ;;  %v59_v15 = vld [vmem:[%s2464_s2] sm:$0xff]  ;;  %v1842_v50 = vld [vmem:[%s2465_s3 + $0x30] sm:$0xff]  ;;  %s1746_s12 = smov 24  }
   0x6   :  { %194 = vmatpush.msra.mxu1 %v1842_v50  ;;  %v1848_v51 = vld [vmem:[%s2465_s3 + $0x20] sm:$0xff]  ;;  %v1854_v52 = vld [vmem:[%s2465_s3 + $0x10] sm:$0xff] }
   0x7   :  { %84 = vmatpush.msra.mxu0 %v68_v5  ;;  %v1860_v53 = vld [vmem:[%s2465_s3] sm:$0xff]  ;;  %v1576_v54 = vpack.i.bf16 %v1848_v51, %v1842_v50 }
   0x8   :  { %v1637_v34 = vpop.eup %1636  ;;  %195 = vmatpush.msra.mxu1 %v1848_v51  ;;  %v1581_v55 = vpack.i.bf16 %v1860_v53, %v1854_v52  ;;  %v1872_v3 = vld [vmem:[%s2466_s6] sm:$0xff] }
   0x9   :  { %85 = vmatpush.msra.mxu0 %v67_v6  ;;  %v109_v35 = vmul.f32 32.0, %v1637_v34  ;;  %vm113_vm6 = vweird.f32 %v1637_v34 }
   0xa   :  { %1555 = vset.pattern.permute.xlu1 %v1735_v8  ;;  %1553 = vset.pattern.permute.xlu0 %v1735_v8 }
   0xb   :  { %49 = vperm.xlu1 %1555, %v30_v1   ;;  %46 = vperm.xlu0 %1553, %v29_v2   ;;  %v110_v36 = vsub.f32 1.0, %v109_v35 }
   0xc   :  { %86 = vmatpush.msra.mxu0 %v66_v7  ;;  %196 = vmatpush.msra.mxu1 %v1854_v52  ;;  %v153_v7 = vperm.slane %v1872_v3, 0 }
   0xd   :  { %v111_v37 = vmul.f32 %v1637_v34, %v110_v36 }
   0xe   :  { %87 = vmatpush.msra.mxu0 %v65_v9  ;;  %197 = vmatpush.msra.mxu1 %v1860_v53 }
   0xf   :  { %v112_v38 = vadd.f32 %v1637_v34, %v111_v37 }
  0x10   :  { %88 = vmatpush.msra.mxu0 %v64_v10 }
  0x11   :  { %v1833_v39 = vsel %vm113_vm6, %v1637_v34, %v112_v38 }
  0x12   :  { %89 = vmatpush.msra.mxu0 %v63_v11  ;;  %v156_v11 = vperm.slane %v1872_v3, 1 }
  0x14   :  { %90 = vmatpush.msra.mxu0 %v62_v12 }
  0x16   :  { %91 = vmatpush.msra.mxu0 %v61_v13 }
  0x18   :  { %92 = vmatpush.msra.mxu0 %v60_v14 }
  0x1a   :  { %93 = vmatpush.msra.mxu0 %v59_v15 }
  0x74   :  { %v35_v17 = vpop.permute.xlu0 %34  ;;  %v38_v18 = vpop.permute.xlu1 %37 }
  0x75   :  { %vm39_vm0 = vcmp.eq.s32.totalorder %v35_v17, %v32_v19  ;;  %vm40_vm3 = vcmp.eq.s32.totalorder %v38_v18, %v32_v19 }
  0x76   :  { %v1449_v22 = vsel %vm39_vm0, 1.0, %v1736_v21  ;;  %v1450_v26 = vsel %vm40_vm3, 1.0, %v1736_v21  ;;  %vm502_vm0 = vcmask 195584  }
  0x7d   :  { %v47_v20 = vpop.permute.xlu0 %46  ;;  %v50_v23 = vpop.permute.xlu1 %49 }
  0x7e   :  { %vm51_vm1 = vcmp.eq.s32.totalorder %v47_v20, %v32_v19  ;;  %vm52_vm4 = vcmp.eq.s32.totalorder %v50_v23, %v32_v19 }
  0x7f   :  { %v1451_v24 = vsel %vm51_vm1, 1.0, %v1736_v21  ;;  %v1452_v27 = vsel %vm52_vm4, 1.0, %v1736_v21 }
  0x80   :  { %v57_v25 = vadd.f32 %v1451_v24, %v1449_v22  ;;  %v58_v28 = vadd.f32 %v1452_v27, %v1450_v26  ;;  %v175_v22 = vperm.slane %v1872_v3, 2 }
  0x82   :  { %1453 = vmatmul.msk.f32.vlgmr.msra.gmra.mxu0 %vm71_vm2, %v57_v25 }
  0x8a   :  { %1454 = vmatmul.msk.f32.gmra.mxu0 %vm71_vm2, %v58_v28 }
  0xff   :  { %v95_v29 = vpop.f32.mrf.mxu0 }
 0x100   :  { %v102_v30 = vsel %vm101_vm5, %v95_v29, 0.0 }
 0x101   :  { %103 = vadd.xlane.f32.xlu2 %v102_v30 }
 0x107   :  { %v98_v31 = vpop.f32.mrf.mxu0 }
 0x108   :  { %v105_v32 = vsel %vm101_vm5, %v98_v31, 0.0 }
 0x109   :  { %106 = vadd.xlane.f32.xlu2 %v105_v32 }
 0x174   :  { %v104_v40 = vpop.xlane.xlu2 %103 }
 0x175   :  { %v115_v41 = vmul.f32 %v1833_v39, %v104_v40 }
 0x177   :  { %v117_v42 = vsub.f32 %v95_v29, %v115_v41  ;;  %v1952_v41 = vld [vmem:[%s2467_s1] sm:$0xff] }
 0x179   :  { %v119_v43 = vmul.f32 %v117_v42, %v117_v42 }
 0x17b   :  { %v121_v44 = vsel %vm101_vm5, %v119_v43, 0.0 }
 0x17c   :  { %122 = vadd.xlane.f32.xlu1 %v121_v44  ;;  %v107_v45 = vpop.xlane.xlu2 %106 }
 0x17d   :  { %v116_v46 = vmul.f32 %v1833_v39, %v107_v45  ;;  %v1959_v45 = vld [vmem:[%s2467_s1 + $0x8] sm:$0xff] }
 0x17f   :  { %v118_v47 = vsub.f32 %v98_v31, %v116_v46 }
 0x181   :  { %v120_v48 = vmul.f32 %v118_v47, %v118_v47 }
 0x183   :  { %v124_v49 = vsel %vm101_vm5, %v120_v48, 0.0 }
 0x184   :  { %125 = vadd.xlane.f32.xlu2 %v124_v49  ;;  %v1966_v49 = vld [vmem:[%s2467_s1 + $0x10] sm:$0xff] }
 0x1ef   :  { %v123_v56 = vpop.xlane.xlu1 %122 }
 0x1f0   :  { %v127_v57 = vmul.f32 %v123_v56, %v1833_v39 }
 0x1f2   :  { %v129_v58 = vadd.f32 1e-05, %v127_v57 }
 0x1f4   :  { %1638 = vrsqrt.f32 %v129_v58  ;;  %vm137_vm8 = vweird.f32 %v129_v58 }
 0x1f7   :  { %v126_v59 = vpop.xlane.xlu2 %125 }
 0x1f8   :  { %v128_v60 = vmul.f32 %v126_v59, %v1833_v39 }
 0x1fa   :  { %v1639_v61 = vpop.eup %1638  ;;  %v130_v62 = vadd.f32 1e-05, %v128_v60 }
 0x1fb   :  { %v132_v63 = vmul.f32 %v1639_v61, %v129_v58  ;;  %vm138_vm7 = vweird.f32 %v1639_v61 }
 0x1fc   :  { %1640 = vrsqrt.f32 %v130_v62  ;;  %vm139_vm9 = vmor %vm137_vm8, %vm138_vm7  ;;  %vm147_vm11 = vweird.f32 %v130_v62 }
 0x1fd   :  { %v133_v0 = vmul.f32 %v1639_v61, %v132_v63 }
 0x1ff   :  { %v134_v1 = vmul.f32 0.5, %v133_v0 }
 0x201   :  { %v135_v2 = vsub.f32 1.5, %v134_v1 }
 0x202   :  { %v1641_v4 = vpop.eup %1640 }
 0x203   :  { %v136_v5 = vmul.f32 %v1639_v61, %v135_v2  ;;  %v142_v6 = vmul.f32 %v1641_v4, %v130_v62  ;;  %vm148_vm10 = vweird.f32 %v1641_v4 }
 0x204   :  { %vm149_vm12 = vmor %vm147_vm11, %vm148_vm10 }
 0x205   :  { %v140_v8 = vsel %vm139_vm9, %v1639_v61, %v136_v5  ;;  %v143_v9 = vmul.f32 %v1641_v4, %v142_v6  ;;  %v1978_v61 = vld [vmem:[%s2467_s1 + $0x20] sm:$0xff] }
 0x206   :  { %v151_v10 = vmul.f32 %v140_v8, %v117_v42  ;;  %v1998_v8 = vld [vmem:[%s2467_s1 + $0x18] sm:$0xff] }
 0x207   :  { %v144_v12 = vmul.f32 0.5, %v143_v9 }
 0x208   :  { %v154_v13 = vmul.f32 %v153_v7, %v151_v10 }
 0x209   :  { %v145_v14 = vsub.f32 1.5, %v144_v12 }
 0x20a   :  { %v1876_v15 = vadd.f32 %v156_v11, %v154_v13  ;;  %v2011_v13 = vld [vmem:[%s2467_s1 + $0x38] sm:$0xff] }
 0x20b   :  { %v146_v16 = vmul.f32 %v1641_v4, %v145_v14 }
 0x20c   :  { %1455 = vmatmul.msk.f32.vlgmr.msra.gmra.mxu1 %vm101_vm5, %v1876_v15 }
 0x20d   :  { %v150_v17 = vsel %vm149_vm12, %v1641_v4, %v146_v16  ;;  %v1991_v4 = vld [vmem:[%s2467_s1 + $0x30] sm:$0xff] }
 0x20e   :  { %v152_v18 = vmul.f32 %v150_v17, %v118_v47 }
 0x210   :  { %v155_v19 = vmul.f32 %v153_v7, %v152_v18 }
 0x212   :  { %v1880_v20 = vadd.f32 %v156_v11, %v155_v19  ;;  %v2005_v11 = vld [vmem:[%s2467_s1 + $0x28] sm:$0xff]  ;;  %s1743_s1 = smov 32  }
 0x214   :  { %1456 = vmatmul.msk.f32.gmra.mxu1 %vm101_vm5, %v1880_v20 }
 0x289   :  { %v199_v21 = vpop.f32.mrf.mxu1 }
 0x28a   :  { %v1891_v25 = vadd.f32 %v199_v21, %v175_v22 }
 0x291   :  { %v202_v23 = vpop.f32.mrf.mxu1 }
 0x292   :  { %v1885_v24 = vadd.f32 %v202_v23, %v175_v22 }
 0x294   :  { %215 = vrot.lane.b32.xlu2 %v1885_v24, %s1738_s13  ;;  %217 = vrot.lane.b32.xlu0 %v1885_v24, %s1739_s14 }
 0x29c   :  { %206 = vrot.lane.b32.xlu2 %v1891_v25, %s1740_s15  ;;  %213 = vrot.lane.b32.xlu0 %v1885_v24, %s1740_s15 }
 0x2a4   :  { %210 = vrot.lane.b32.xlu0 %v1891_v25, %s1739_s14 }
 0x2ac   :  { %208 = vrot.lane.b32.xlu0 %v1891_v25, %s1738_s13 }
 0x2ee   :  { %v1901_v26 = vpop.permute.xlu2 %215 }
 0x2ef   :  { %231 = vrot.lane.b32.xlu2 %v1901_v26, %s1741_s16 }
 0x2f6   :  { %v1916_v30 = vpop.permute.xlu2 %206 }
 0x2f7   :  { %v1571_v19 = vpack.i.bf16 %v1891_v25, %v1916_v30 }
 0x306   :  { %v1905_v27 = vpop.permute.xlu0 %217 }
 0x307   :  { %233 = vrot.lane.b32.xlu0 %v1905_v27, %s1741_s16  ;;  %v1556_v1 = vpack.i.bf16 %v1901_v26, %v1905_v27 }
 0x30e   :  { %v214_v28 = vpop.permute.xlu0 %213 }
 0x30f   :  { %227 = vrot.lane.b32.xlu0 %v1885_v24, %s1741_s16  ;;  %229 = vrot.lane.b32.xlu1 %v214_v28, %s1741_s16  ;;  %v1561_v60 = vpack.i.bf16 %v1885_v24, %v214_v28 }
 0x316   :  { %v1912_v29 = vpop.permute.xlu0 %210 }
 0x317   :  { %225 = vrot.lane.b32.xlu2 %v1912_v29, %s1741_s16 }
 0x31e   :  { %v1918_v31 = vpop.permute.xlu0 %208 }
 0x31f   :  { %221 = vrot.lane.b32.xlu2 %v1916_v30, %s1741_s16  ;;  %223 = vrot.lane.b32.xlu0 %v1918_v31, %s1741_s16 }
 0x327   :  { %219 = vrot.lane.b32.xlu0 %v1891_v25, %s1741_s16 }
 0x349   :  { %v232_v33 = vpop.permute.xlu2 %231 }
 0x371   :  { %v226_v36 = vpop.permute.xlu2 %225 }
 0x379   :  { %v234_v32 = vpop.permute.xlu0 %233  ;;  %v222_v38 = vpop.permute.xlu2 %221 }
 0x37a   :  { %1457 = vmatpush.xpose.msk.msra.mxu2 %vm235_vm13, %v234_v32 }
 0x37e   :  { %1458 = vmatpush.xpose.msk.msra.mxu2 %vm235_vm13, %v232_v33 }
 0x381   :  { %v230_v34 = vpop.permute.xlu1 %229  ;;  %v228_v35 = vpop.permute.xlu0 %227 }
 0x382   :  { %1459 = vmatpush.xpose.msk.msra.mxu2 %vm235_vm13, %v230_v34 }
 0x386   :  { %1460 = vmatpush.xpose.msk.msra.mxu2 %vm235_vm13, %v228_v35  ;;  %v1566_v35 = vpack.i.bf16 %v1918_v31, %v1912_v29 }
 0x38a   :  { %1461 = vmatpush.xpose.msk.msra.mxu2 %vm235_vm13, %v226_v36 }
 0x391   :  { %v224_v37 = vpop.permute.xlu0 %223 }
 0x392   :  { %1462 = vmatpush.xpose.msk.msra.mxu2 %vm235_vm13, %v224_v37 }
 0x396   :  { %1463 = vmatpush.xpose.msk.msra.mxu2 %vm235_vm13, %v222_v38 }
 0x399   :  { %v220_v40 = vpop.permute.xlu0 %219 }
 0x39a   :  { %1464 = vmatpush.xpose.msk.msra.mxu2 %vm235_vm13, %v220_v40 }
 0x39d   :  { %1465 = vmatmul.msk.f32.vlgmr.msra.gmra.mxu2 %vm235_vm13, %v1891_v25 }
 0x3a5   :  { %1466 = vmatmul.msk.f32.gmra.mxu2 %vm235_vm13, %v1916_v30 }
 0x3ad   :  { %1467 = vmatmul.msk.f32.gmra.mxu2 %vm235_vm13, %v1918_v31 }
 0x3b5   :  { %1468 = vmatmul.msk.f32.gmra.mxu2 %vm235_vm13, %v1912_v29 }
 0x3bd   :  { %1469 = vmatmul.msk.f32.gmra.mxu2 %vm235_vm13, %v1885_v24 }
 0x3c5   :  { %1470 = vmatmul.msk.f32.gmra.mxu2 %vm235_vm13, %v214_v28 }
 0x3cd   :  { %1471 = vmatmul.msk.f32.gmra.mxu2 %vm235_vm13, %v1901_v26 }
 0x3d5   :  { %1472 = vmatmul.msk.f32.gmra.mxu2 %vm235_vm13, %v1905_v27 }
 0x420   :  { %v285_v42 = vpop.f32.mrf.mxu2 }
 0x421   :  { %v286_v43 = vadd.f32 %v285_v42, %v1952_v41 }
 0x423   :  { %v310_v44 = vsel %vm309_vm14, %v286_v43, -inf }
 0x424   :  { %311 = vmax.xlane.f32.xlu2 %v310_v44 }
 0x428   :  { %v288_v46 = vpop.f32.mrf.mxu2 }
 0x429   :  { %v289_v47 = vadd.f32 %v288_v46, %v1959_v45 }
 0x42b   :  { %v313_v48 = vsel %vm309_vm14, %v289_v47, -inf }
 0x42c   :  { %314 = vmax.xlane.f32.xlu1 %v313_v48 }
 0x430   :  { %v291_v56 = vpop.f32.mrf.mxu2 }
 0x431   :  { %v1969_v57 = vadd.f32 %v291_v56, %v1966_v49 }
 0x433   :  { %v316_v58 = vsel %vm309_vm14, %v1969_v57, -inf }
 0x434   :  { %317 = vmax.xlane.f32.xlu0 %v316_v58 }
 0x438   :  { %v294_v59 = vpop.f32.mrf.mxu2 }
 0x439   :  { %v295_v9 = vadd.f32 %v294_v59, %v1998_v8 }
 0x43b   :  { %v319_v10 = vsel %vm309_vm14, %v295_v9, -inf }
 0x43c   :  { %1562 = vrot.lane.b32.xlu2 %v1561_v60, %s1742_s23 }
 0x440   :  { %v297_v62 = vpop.f32.mrf.mxu2 }
 0x441   :  { %v1981_v63 = vadd.f32 %v297_v62, %v1978_v61 }
 0x443   :  { %v322_v0 = vsel %vm309_vm14, %v1981_v63, -inf }
 0x444   :  { %323 = vmax.xlane.f32.xlu1 %v322_v0 }
 0x448   :  { %v300_v2 = vpop.f32.mrf.mxu2  ;;  %1557 = vrot.lane.b32.xlu0 %v1556_v1, %s1742_s23 }
 0x449   :  { %v301_v12 = vadd.f32 %v300_v2, %v2005_v11 }
 0x44b   :  { %v325_v16 = vsel %vm309_vm14, %v301_v12, -inf }
 0x450   :  { %v303_v5 = vpop.f32.mrf.mxu2 }
 0x451   :  { %v304_v6 = vadd.f32 %v303_v5, %v1991_v4 }
 0x453   :  { %v328_v7 = vsel %vm309_vm14, %v304_v6, -inf }
 0x454   :  { %329 = vmax.xlane.f32.xlu1 %v328_v7 }
 0x458   :  { %v306_v14 = vpop.f32.mrf.mxu2 }
 0x459   :  { %v2015_v17 = vadd.f32 %v306_v14, %v2011_v13 }
 0x45b   :  { %v331_v18 = vsel %vm309_vm14, %v2015_v17, -inf }
 0x465   :  { %320 = vmax.xlane.f32.xlu2 %v319_v10 }
 0x46d   :  { %326 = vmax.xlane.f32.xlu2 %v325_v16 }
 0x472   :  { %332 = vmax.xlane.f32.xlu0 %v331_v18 }
 0x485   :  { %1572 = vrot.lane.b32.xlu2 %v1571_v19, %s1742_s23 }
 0x497   :  { %v312_v21 = vpop.xlane.xlu2 %311 }
 0x498   :  { %v334_v22 = vsub.f32 %v286_v43, %v312_v21 }
 0x49a   :  { %v342_v23 = vmul.f32 1.442695, %v334_v22 }
 0x49c   :  { %1642 = vpow2.f32 %v342_v23 }
 0x49f   :  { %v315_v24 = vpop.xlane.xlu1 %314  ;;  %v1563_v37 = vpop.permute.xlu2 %1562 }
 0x4a0   :  { %v335_v26 = vsub.f32 %v289_v47, %v315_v24  ;;  %v1564_v42 = vunpack.i.l.bf16 %v1563_v37  ;;  %v1565_v43 = vunpack.i.h.bf16 %v1563_v37 }
 0x4a2   :  { %v2022_v27 = vpop.eup %1642  ;;  %v344_v28 = vmul.f32 1.442695, %v335_v26 }
 0x4a3   :  { %v358_v32 = vsel %vm309_vm14, %v2022_v27, 0.0 }
 0x4a4   :  { %1644 = vpow2.f32 %v344_v28  ;;  %359 = vadd.xlane.f32.xlu1 %v358_v32 }
 0x4a7   :  { %v318_v30 = vpop.xlane.xlu0 %317 }
 0x4a8   :  { %v336_v31 = vsub.f32 %v1969_v57, %v318_v30 }
 0x4aa   :  { %v2026_v33 = vpop.eup %1644  ;;  %v346_v56 = vmul.f32 1.442695, %v336_v31 }
 0x4ab   :  { %v361_v25 = vsel %vm309_vm14, %v2026_v33, 0.0 }
 0x4ae   :  { %362 = vadd.xlane.f32.xlu2 %v361_v25 }
 0x4b7   :  { %v324_v40 = vpop.xlane.xlu1 %323 }
 0x4b8   :  { %v338_v60 = vsub.f32 %v1981_v63, %v324_v40 }
 0x4ba   :  { %v1558_v34 = vpop.permute.xlu0 %1557  ;;  %v350_v0 = vmul.f32 1.442695, %v338_v60 }
 0x4bb   :  { %v1559_v36 = vunpack.i.l.bf16 %v1558_v34  ;;  %v1560_v38 = vunpack.i.h.bf16 %v1558_v34 }
 0x4bd   :  { %454 = vmatpush.msra.mxu3 %v1559_v36  ;;  %1567 = vrot.lane.b32.xlu1 %v1566_v35, %s1742_s23 }
 0x4bf   :  { %455 = vmatpush.msra.mxu3 %v1560_v38 }
 0x4c1   :  { %456 = vmatpush.msra.mxu3 %v1564_v42 }
 0x4c3   :  { %457 = vmatpush.msra.mxu3 %v1565_v43 }
 0x4c7   :  { %v330_v44 = vpop.xlane.xlu1 %329 }
 0x4c8   :  { %v340_v46 = vsub.f32 %v304_v6, %v330_v44 }
 0x4ca   :  { %v354_v47 = vmul.f32 1.442695, %v340_v46 }
 0x4cc   :  { %1646 = vpow2.f32 %v354_v47 }
 0x4cd   :  { %1648 = vpow2.f32 %v346_v56 }
 0x4d2   :  { %v2033_v48 = vpop.eup %1646 }
 0x4d3   :  { %v376_v29 = vsel %vm309_vm14, %v2033_v48, 0.0  ;;  %v1649_v2 = vpop.eup %1648 }
 0x4d4   :  { %377 = vadd.xlane.f32.xlu2 %v376_v29  ;;  %v364_v57 = vsel %vm309_vm14, %v1649_v2, 0.0 }
 0x4d8   :  { %v321_v58 = vpop.xlane.xlu2 %320 }
 0x4d9   :  { %v337_v59 = vsub.f32 %v295_v9, %v321_v58 }
 0x4db   :  { %v348_v62 = vmul.f32 1.442695, %v337_v59 }
 0x4dd   :  { %1650 = vpow2.f32 %v348_v62 }
 0x4de   :  { %1652 = vpow2.f32 %v350_v0 }
 0x4e0   :  { %v327_v1 = vpop.xlane.xlu2 %326 }
 0x4e1   :  { %v339_v6 = vsub.f32 %v301_v12, %v327_v1 }
 0x4e3   :  { %v1651_v5 = vpop.eup %1650  ;;  %v352_v10 = vmul.f32 1.442695, %v339_v6 }
 0x4e4   :  { %v367_v7 = vsel %vm309_vm14, %v1651_v5, 0.0  ;;  %v1653_v9 = vpop.eup %1652 }
 0x4e5   :  { %368 = vadd.xlane.f32.xlu0 %v367_v7  ;;  %v333_v14 = vpop.xlane.xlu0 %332  ;;  %1654 = vpow2.f32 %v352_v10  ;;  %v370_v16 = vsel %vm309_vm14, %v1653_v9, 0.0 }
 0x4e6   :  { %v341_v63 = vsub.f32 %v2015_v17, %v333_v14 }
 0x4e7   :  { %365 = vadd.xlane.f32.xlu1 %v364_v57 }
 0x4e8   :  { %v356_v18 = vmul.f32 1.442695, %v341_v63  ;;  %v1573_v24 = vpop.permute.xlu2 %1572 }
 0x4e9   :  { %v1574_v30 = vunpack.i.l.bf16 %v1573_v24  ;;  %v1575_v34 = vunpack.i.h.bf16 %v1573_v24 }
 0x4ea   :  { %1656 = vpow2.f32 %v356_v18 }
 0x4eb   :  { %v1655_v19 = vpop.eup %1654 }
 0x4ec   :  { %v373_v12 = vsel %vm309_vm14, %v1655_v19, 0.0 }
 0x4ed   :  { %371 = vadd.xlane.f32.xlu0 %v370_v16 }
 0x4f0   :  { %v1657_v21 = vpop.eup %1656 }
 0x4f1   :  { %v379_v22 = vsel %vm309_vm14, %v1657_v21, 0.0 }
 0x4f5   :  { %374 = vadd.xlane.f32.xlu0 %v373_v12 }
 0x4fd   :  { %380 = vadd.xlane.f32.xlu0 %v379_v22 }
 0x500   :  { %1577 = vrot.lane.b32.xlu1 %v1576_v54, %s1743_s1 }
 0x511   :  { %1582 = vrot.lane.b32.xlu0 %v1581_v55, %s1743_s1 }
 0x517   :  { %v360_v23 = vpop.xlane.xlu1 %359 }
 0x518   :  { %1658 = vrcp.f32 %v360_v23 }
 0x51e   :  { %v1659_v25 = vpop.eup %1658 }
 0x51f   :  { %v390_v35 = vmul.f32 %v1659_v25, %v2022_v27 }
 0x521   :  { %v363_v32 = vpop.xlane.xlu2 %362 }
 0x522   :  { %1660 = vrcp.f32 %v363_v32 }
 0x528   :  { %v1661_v36 = vpop.eup %1660 }
 0x529   :  { %v391_v37 = vmul.f32 %v1661_v36, %v2026_v33 }
 0x52f   :  { %v1568_v26 = vpop.permute.xlu1 %1567 }
 0x530   :  { %v1569_v28 = vunpack.i.l.bf16 %v1568_v26  ;;  %v1570_v17 = vunpack.i.h.bf16 %v1568_v26 }
 0x532   :  { %458 = vmatpush.msra.mxu3 %v1569_v28 }
 0x534   :  { %459 = vmatpush.msra.mxu3 %v1570_v17  ;;  %v519_v17 = vperm.slane %v1872_v3, 3 }
 0x536   :  { %460 = vmatpush.msra.mxu3 %v1574_v30 }
 0x538   :  { %461 = vmatpush.msra.mxu3 %v1575_v34 }
 0x539   :  { %1473 = vmatmul.msk.f32.vlgmr.msra.gmra.mxu3 %vm309_vm14, %v390_v35 }
 0x541   :  { %1474 = vmatmul.msk.f32.gmra.mxu3 %vm309_vm14, %v391_v37 }
 0x547   :  { %v378_v52 = vpop.xlane.xlu2 %377 }
 0x558   :  { %v369_v27 = vpop.xlane.xlu0 %368 }
 0x55a   :  { %v366_v38 = vpop.xlane.xlu1 %365 }
 0x55b   :  { %1662 = vrcp.f32 %v366_v38 }
 0x55c   :  { %1664 = vrcp.f32 %v369_v27 }
 0x560   :  { %v372_v33 = vpop.xlane.xlu0 %371 }
 0x561   :  { %v1663_v40 = vpop.eup %1662  ;;  %1666 = vrcp.f32 %v372_v33 }
 0x562   :  { %v392_v42 = vmul.f32 %v1663_v40, %v1649_v2  ;;  %v1665_v43 = vpop.eup %1664 }
 0x563   :  { %v393_v44 = vmul.f32 %v1665_v43, %v1651_v5 }
 0x564   :  { %1475 = vmatmul.msk.f32.gmra.mxu3 %vm309_vm14, %v392_v42 }
 0x567   :  { %v1667_v51 = vpop.eup %1666 }
 0x568   :  { %v375_v50 = vpop.xlane.xlu0 %374  ;;  %v394_v54 = vmul.f32 %v1667_v51, %v1653_v9 }
 0x569   :  { %1668 = vrcp.f32 %v375_v50 }
 0x56a   :  { %1670 = vrcp.f32 %v378_v52  ;;  %v172_v52 = vld [vmem:[%s2465_s3 + $0x28] sm:$0xff] }
 0x56c   :  { %1476 = vmatmul.msk.f32.gmra.mxu3 %vm309_vm14, %v393_v44 }
 0x56f   :  { %v1669_v53 = vpop.eup %1668 }
 0x570   :  { %v395_v55 = vmul.f32 %v1669_v53, %v1655_v19  ;;  %v381_v46 = vpop.xlane.xlu0 %380  ;;  %v1671_v47 = vpop.eup %1670  ;;  %v170_v53 = vld [vmem:[%s2465_s3 + $0x18] sm:$0xff] }
 0x571   :  { %1672 = vrcp.f32 %v381_v46  ;;  %v396_v29 = vmul.f32 %v1671_v47, %v2033_v48 }
 0x572   :  { %v1578_v5 = vpop.permute.xlu1 %1577 }
 0x573   :  { %v1579_v7 = vunpack.i.l.bf16 %v1578_v5  ;;  %v1580_v57 = vunpack.i.h.bf16 %v1578_v5 }
 0x574   :  { %1477 = vmatmul.msk.f32.gmra.mxu3 %vm309_vm14, %v394_v54 }
 0x575   :  { %554 = vmatpush.msrb.mxu1 %v1579_v7 }
 0x577   :  { %v1673_v31 = vpop.eup %1672  ;;  %555 = vmatpush.msrb.mxu1 %v1580_v57 }
 0x578   :  { %v397_v56 = vmul.f32 %v1673_v31, %v1657_v21 }
 0x57c   :  { %1478 = vmatmul.msk.f32.gmra.mxu3 %vm309_vm14, %v395_v55  ;;  %v168_v55 = vld [vmem:[%s2465_s3 + $0x8] sm:$0xff] }
 0x583   :  { %v1583_v6 = vpop.permute.xlu0 %1582 }
 0x584   :  { %1479 = vmatmul.msk.f32.gmra.mxu3 %vm309_vm14, %v396_v29  ;;  %v1584_v10 = vunpack.i.l.bf16 %v1583_v6  ;;  %v1585_v14 = vunpack.i.h.bf16 %v1583_v6 }
 0x586   :  { %556 = vmatpush.msrb.mxu1 %v1584_v10 }
 0x588   :  { %557 = vmatpush.msrb.mxu1 %v1585_v14 }
 0x58c   :  { %1480 = vmatmul.msk.f32.gmra.mxu3 %vm309_vm14, %v397_v56 }
 0x5bc   :  { %v463_v58 = vpop.f32.mrf.mxu3 }
 0x5c4   :  { %v466_v59 = vpop.f32.mrf.mxu3 }
 0x5c5   :  { %488 = vrot.lane.b32.xlu2 %v466_v59, %s1744_s10 }
 0x5e7   :  { %v469_v60 = vpop.f32.mrf.mxu3 }
 0x5e8   :  { %492 = vrot.lane.b32.xlu1 %v469_v60, %s1745_s11 }
 0x5ef   :  { %v472_v62 = vpop.f32.mrf.mxu3 }
 0x5f0   :  { %496 = vrot.lane.b32.xlu2 %v472_v62, %s1746_s12 }
 0x5f7   :  { %v475_v48 = vpop.f32.mrf.mxu3 }
 0x5ff   :  { %v478_v0 = vpop.f32.mrf.mxu3 }
 0x600   :  { %505 = vrot.lane.b32.xlu0 %v478_v0, %s1744_s10 }
 0x607   :  { %v481_v1 = vpop.f32.mrf.mxu3 }
 0x608   :  { %509 = vrot.lane.b32.xlu1 %v481_v1, %s1745_s11 }
 0x60f   :  { %v484_v2 = vpop.f32.mrf.mxu3 }
 0x610   :  { %513 = vrot.lane.b32.xlu2 %v484_v2, %s1746_s12  ;;  %v614_v2 = vperm.slane %v1872_v3, 5 }
 0x61f   :  { %v489_v9 = vpop.permute.xlu2 %488 }
 0x620   :  { %v499_v63 = vsel %vm235_vm13, %v463_v58, %v489_v9 }
 0x64a   :  { %v497_v18 = vpop.permute.xlu2 %496 }
 0x65a   :  { %v493_v16 = vpop.permute.xlu1 %492 }
 0x65b   :  { %v501_v19 = vsel %vm500_vm15, %v499_v63, %v493_v16 }
 0x65c   :  { %v503_v12 = vsel %vm502_vm0, %v501_v19, %v497_v18 }
 0x65d   :  { %1481 = vmatmul.msk.f32.vlgmr.msrb.gmra.mxu1 %vm101_vm5, %v503_v12 }
 0x66a   :  { %v514_v24 = vpop.permute.xlu2 %513 }
 0x672   :  { %v506_v21 = vpop.permute.xlu0 %505 }
 0x673   :  { %v516_v22 = vsel %vm235_vm13, %v475_v48, %v506_v21  ;;  %v611_v48 = vperm.slane %v1872_v3, 4 }
 0x67a   :  { %v510_v23 = vpop.permute.xlu1 %509 }
 0x67b   :  { %v517_v26 = vsel %vm500_vm15, %v516_v22, %v510_v23 }
 0x67c   :  { %v518_v28 = vsel %vm502_vm0, %v517_v26, %v514_v24  ;;  %v672_v24 = vld [vmem:[%s2468_s4 + $0x38] sm:$0xff]  ;;  %v671_v26 = vld [vmem:[%s2468_s4 + $0x30] sm:$0xff] }
 0x67d   :  { %1482 = vmatmul.msk.f32.gmra.mxu1 %vm101_vm5, %v518_v28  ;;  %v670_v28 = vld [vmem:[%s2468_s4 + $0x28] sm:$0xff] }
 0x67e   :  { %688 = vmatpush.msra.mxu1 %v672_v24 }
 0x680   :  { %689 = vmatpush.msra.mxu1 %v671_v26 }
 0x682   :  { %690 = vmatpush.msra.mxu1 %v670_v28 }
 0x6da   :  { %v559_v32 = vpop.f32.mrf.mxu1 }
 0x6db   :  { %v560_v25 = vadd.f32 %v559_v32, %v519_v17  ;;  %v668_v32 = vld [vmem:[%s2468_s4 + $0x18] sm:$0xff] }
 0x6dd   :  { %v565_v30 = vadd.f32 %v560_v25, %v1876_v15  ;;  %v667_v25 = vld [vmem:[%s2468_s4 + $0x10] sm:$0xff] }
 0x6df   :  { %v567_v34 = vsel %vm101_vm5, %v565_v30, 0.0 }
 0x6e0   :  { %568 = vadd.xlane.f32.xlu0 %v567_v34  ;;  %v665_v34 = vld [vmem:[%s2468_s4] sm:$0xff] }
 0x6fa   :  { %v562_v35 = vpop.f32.mrf.mxu1 }
 0x6fb   :  { %v563_v36 = vadd.f32 %v562_v35, %v519_v17  ;;  %v669_v17 = vld [vmem:[%s2468_s4 + $0x20] sm:$0xff]  ;;  %v617_v35 = vperm.slane %v1872_v3, 6 }
 0x6fc   :  { %691 = vmatpush.msra.mxu1 %v669_v17 }
 0x6fd   :  { %v566_v37 = vadd.f32 %v563_v36, %v1880_v20  ;;  %v174_v20 = vld [vmem:[%s2465_s3 + $0x38] sm:$0xff] }
 0x6fe   :  { %636 = vmatpush.msrb.mxu0 %v174_v20  ;;  %692 = vmatpush.msra.mxu1 %v668_v32 }
 0x6ff   :  { %v570_v27 = vsel %vm101_vm5, %v566_v37, 0.0 }
 0x700   :  { %571 = vadd.xlane.f32.xlu1 %v570_v27  ;;  %637 = vmatpush.msrb.mxu0 %v172_v52 }
 0x701   :  { %693 = vmatpush.msra.mxu1 %v667_v25 }
 0x702   :  { %638 = vmatpush.msrb.mxu0 %v170_v53 }
 0x704   :  { %639 = vmatpush.msrb.mxu0 %v168_v55 }
 0x753   :  { %v569_v38 = vpop.xlane.xlu0 %568 }
 0x754   :  { %v573_v40 = vmul.f32 %v569_v38, %v1833_v39 }
 0x756   :  { %v575_v42 = vsub.f32 %v565_v30, %v573_v40  ;;  %v666_v30 = vld [vmem:[%s2468_s4 + $0x8] sm:$0xff] }
 0x757   :  { %694 = vmatpush.msra.mxu1 %v666_v30 }
 0x758   :  { %v577_v33 = vmul.f32 %v575_v42, %v575_v42 }
 0x759   :  { %695 = vmatpush.msra.mxu1 %v665_v34 }
 0x75a   :  { %v579_v43 = vsel %vm101_vm5, %v577_v33, 0.0 }
 0x75b   :  { %580 = vadd.xlane.f32.xlu2 %v579_v43 }
 0x773   :  { %v572_v44 = vpop.xlane.xlu1 %571 }
 0x774   :  { %v574_v15 = vmul.f32 %v572_v44, %v1833_v39 }
 0x776   :  { %v576_v50 = vsub.f32 %v566_v37, %v574_v15 }
 0x778   :  { %v578_v51 = vmul.f32 %v576_v50, %v576_v50 }
 0x77a   :  { %v582_v54 = vsel %vm101_vm5, %v578_v51, 0.0 }
 0x77b   :  { %583 = vadd.xlane.f32.xlu0 %v582_v54 }
 0x7ce   :  { %v581_v46 = vpop.xlane.xlu2 %580 }
 0x7cf   :  { %v585_v47 = vmul.f32 %v581_v46, %v1833_v39 }
 0x7d1   :  { %v587_v29 = vadd.f32 1e-05, %v585_v47 }
 0x7d3   :  { %1674 = vrsqrt.f32 %v587_v29  ;;  %vm595_vm3 = vweird.f32 %v587_v29 }
 0x7d9   :  { %v1675_v31 = vpop.eup %1674 }
 0x7da   :  { %v590_v56 = vmul.f32 %v1675_v31, %v587_v29  ;;  %vm596_vm1 = vweird.f32 %v1675_v31 }
 0x7db   :  { %vm597_vm4 = vmor %vm595_vm3, %vm596_vm1 }
 0x7dc   :  { %v591_v58 = vmul.f32 %v1675_v31, %v590_v56 }
 0x7de   :  { %v592_v59 = vmul.f32 0.5, %v591_v58  ;;  %v673_v58 = vperm.slane %v1872_v3, 7 }
 0x7e0   :  { %v593_v60 = vsub.f32 1.5, %v592_v59 }
 0x7e2   :  { %v594_v62 = vmul.f32 %v1675_v31, %v593_v60 }
 0x7e4   :  { %v598_v0 = vsel %vm597_vm4, %v1675_v31, %v594_v62 }
 0x7e5   :  { %v609_v1 = vmul.f32 %v598_v0, %v575_v42 }
 0x7e7   :  { %v612_v5 = vmul.f32 %v611_v48, %v609_v1 }
 0x7e9   :  { %v2102_v6 = vadd.f32 %v614_v2, %v612_v5 }
 0x7eb   :  { %1483 = vmatmul.msk.f32.vlgmr.msrb.gmra.mxu0 %vm101_vm5, %v2102_v6 }
 0x7ee   :  { %v584_v7 = vpop.xlane.xlu0 %583 }
 0x7ef   :  { %v586_v57 = vmul.f32 %v584_v7, %v1833_v39 }
 0x7f1   :  { %v588_v10 = vadd.f32 1e-05, %v586_v57 }
 0x7f3   :  { %1676 = vrsqrt.f32 %v588_v10  ;;  %vm605_vm7 = vweird.f32 %v588_v10 }
 0x7f9   :  { %v1677_v14 = vpop.eup %1676 }
 0x7fa   :  { %v600_v9 = vmul.f32 %v1677_v14, %v588_v10  ;;  %vm606_vm6 = vweird.f32 %v1677_v14 }
 0x7fb   :  { %vm607_vm8 = vmor %vm605_vm7, %vm606_vm6 }
 0x7fc   :  { %v601_v63 = vmul.f32 %v1677_v14, %v600_v9 }
 0x7fe   :  { %v602_v16 = vmul.f32 0.5, %v601_v63 }
 0x800   :  { %v603_v18 = vsub.f32 1.5, %v602_v16 }
 0x802   :  { %v604_v19 = vmul.f32 %v1677_v14, %v603_v18 }
 0x804   :  { %v608_v12 = vsel %vm607_vm8, %v1677_v14, %v604_v19  ;;  %v2146_v19 = vld [vmem:[%s2465_s3 + $0x70] sm:$0xff] }
 0x805   :  { %v610_v21 = vmul.f32 %v608_v12, %v576_v50  ;;  %783 = vmatpush.msra.mxu0 %v2146_v19  ;;  %v2152_v12 = vld [vmem:[%s2465_s3 + $0x60] sm:$0xff] }
 0x807   :  { %v613_v22 = vmul.f32 %v611_v48, %v610_v21  ;;  %784 = vmatpush.msra.mxu0 %v2152_v12  ;;  %v1606_v21 = vpack.i.bf16 %v2152_v12, %v2146_v19 }
 0x809   :  { %v616_v23 = vadd.f32 %v614_v2, %v613_v22  ;;  %v2160_v22 = vld [vmem:[%s2465_s3 + $0x50] sm:$0xff] }
 0x80a   :  { %785 = vmatpush.msra.mxu0 %v2160_v22 }
 0x80b   :  { %1484 = vmatmul.msk.f32.gmra.mxu0 %vm101_vm5, %v616_v23 }
 0x868   :  { %v641_v36 = vpop.f32.mrf.mxu0 }
 0x869   :  { %v642_v37 = vadd.f32 %v641_v36, %v617_v35 }
 0x86b   :  { %v647_v27 = vmul.f32 %v642_v37, %v642_v37 }
 0x86d   :  { %v649_v38 = vmul.f32 %v647_v27, %v642_v37 }
 0x86f   :  { %v651_v40 = vmul.f32 0.044715, %v649_v38 }
 0x871   :  { %v653_v42 = vadd.f32 %v651_v40, %v642_v37 }
 0x873   :  { %v655_v33 = vmul.f32 0.7978846, %v653_v42 }
 0x875   :  { %1678 = vtanh.f32 %v655_v33 }
 0x87b   :  { %v1679_v43 = vpop.eup %1678 }
 0x87c   :  { %v659_v44 = vadd.f32 1.0, %v1679_v43 }
 0x87e   :  { %v661_v15 = vmul.f32 0.5, %v659_v44 }
 0x880   :  { %v663_v50 = vmul.f32 %v661_v15, %v642_v37 }
 0x882   :  { %1485 = vmatmul.msk.f32.vlgmr.msra.gmra.mxu1 %vm309_vm14, %v663_v50 }
 0x888   :  { %v644_v51 = vpop.f32.mrf.mxu0 }
 0x889   :  { %v645_v54 = vadd.f32 %v644_v51, %v617_v35  ;;  %v2175_v35 = vld [vmem:[%s2466_s6 + $0x8] sm:$0xff] }
 0x88a   :  { %v749_v27 = vperm.slane %v2175_v35, 0  ;;  %v752_v42 = vperm.slane %v2175_v35, 1 }
 0x88b   :  { %v648_v20 = vmul.f32 %v645_v54, %v645_v54 }
 0x88d   :  { %v650_v52 = vmul.f32 %v648_v20, %v645_v54 }
 0x88f   :  { %v652_v53 = vmul.f32 0.044715, %v650_v52 }
 0x891   :  { %v654_v55 = vadd.f32 %v652_v53, %v645_v54 }
 0x893   :  { %v656_v46 = vmul.f32 0.7978846, %v654_v55 }
 0x895   :  { %1680 = vtanh.f32 %v656_v46 }
 0x89b   :  { %v1681_v47 = vpop.eup %1680 }
 0x89c   :  { %v660_v29 = vadd.f32 1.0, %v1681_v47 }
 0x89e   :  { %v662_v31 = vmul.f32 0.5, %v660_v29 }
 0x8a0   :  { %v664_v56 = vmul.f32 %v662_v31, %v645_v54 }
 0x8a2   :  { %1486 = vmatmul.msk.f32.gmra.mxu1 %vm309_vm14, %v664_v56 }
 0x8ff   :  { %v697_v59 = vpop.f32.mrf.mxu1 }
 0x900   :  { %v698_v60 = vadd.f32 %v697_v59, %v673_v58 }
 0x902   :  { %v703_v62 = vadd.f32 %v698_v60, %v2102_v6 }
 0x904   :  { %v705_v48 = vsel %vm101_vm5, %v703_v62, 0.0 }
 0x905   :  { %706 = vadd.xlane.f32.xlu1 %v705_v48 }
 0x91f   :  { %v700_v0 = vpop.f32.mrf.mxu1 }
 0x920   :  { %v701_v1 = vadd.f32 %v700_v0, %v673_v58  ;;  %v764_v58 = vperm.slane %v2175_v35, 2 }
 0x922   :  { %v704_v2 = vadd.f32 %v701_v1, %v616_v23  ;;  %v2165_v23 = vld [vmem:[%s2465_s3 + $0x40] sm:$0xff] }
 0x923   :  { %v1611_v24 = vpack.i.bf16 %v2165_v23, %v2160_v22  ;;  %786 = vmatpush.msra.mxu0 %v2165_v23 }
 0x924   :  { %v708_v5 = vsel %vm101_vm5, %v704_v2, 0.0 }
 0x925   :  { %709 = vadd.xlane.f32.xlu2 %v708_v5 }
 0x978   :  { %v707_v7 = vpop.xlane.xlu1 %706 }
 0x979   :  { %v711_v57 = vmul.f32 %v707_v7, %v1833_v39 }
 0x97b   :  { %v713_v10 = vsub.f32 %v703_v62, %v711_v57 }
 0x97d   :  { %v715_v14 = vmul.f32 %v713_v10, %v713_v10 }
 0x97f   :  { %v717_v3 = vsel %vm101_vm5, %v715_v14, 0.0 }
 0x980   :  { %718 = vadd.xlane.f32.xlu0 %v717_v3 }
 0x998   :  { %v710_v9 = vpop.xlane.xlu2 %709 }
 0x999   :  { %v712_v6 = vmul.f32 %v710_v9, %v1833_v39 }
 0x99b   :  { %v714_v63 = vsub.f32 %v704_v2, %v712_v6 }
 0x99d   :  { %v716_v16 = vmul.f32 %v714_v63, %v714_v63 }
 0x99f   :  { %v720_v18 = vsel %vm101_vm5, %v716_v16, 0.0 }
 0x9a0   :  { %721 = vadd.xlane.f32.xlu1 %v720_v18 }
 0x9f3   :  { %v719_v26 = vpop.xlane.xlu0 %718 }
 0x9f4   :  { %v723_v28 = vmul.f32 %v719_v26, %v1833_v39 }
 0x9f6   :  { %v725_v17 = vadd.f32 1e-05, %v723_v28 }
 0x9f8   :  { %1682 = vrsqrt.f32 %v725_v17  ;;  %vm733_vm10 = vweird.f32 %v725_v17 }
 0x9fe   :  { %v1683_v32 = vpop.eup %1682 }
 0x9ff   :  { %v728_v25 = vmul.f32 %v1683_v32, %v725_v17  ;;  %vm734_vm9 = vweird.f32 %v1683_v32 }
 0xa00   :  { %vm735_vm11 = vmor %vm733_vm10, %vm734_vm9 }
 0xa01   :  { %v729_v30 = vmul.f32 %v1683_v32, %v728_v25 }
 0xa03   :  { %v730_v34 = vmul.f32 0.5, %v729_v30 }
 0xa05   :  { %v731_v36 = vsub.f32 1.5, %v730_v34 }
 0xa07   :  { %v732_v37 = vmul.f32 %v1683_v32, %v731_v36 }
 0xa09   :  { %v736_v38 = vsel %vm735_vm11, %v1683_v32, %v732_v37 }
 0xa0a   :  { %v747_v40 = vmul.f32 %v736_v38, %v713_v10 }
 0xa0c   :  { %v750_v33 = vmul.f32 %v749_v27, %v747_v40 }
 0xa0e   :  { %v2179_v43 = vadd.f32 %v752_v42, %v750_v33 }
 0xa10   :  { %1495 = vmatmul.msk.f32.vlgmr.msra.gmra.mxu0 %vm101_vm5, %v2179_v43 }
 0xa13   :  { %v722_v44 = vpop.xlane.xlu1 %721 }
 0xa14   :  { %v724_v15 = vmul.f32 %v722_v44, %v1833_v39 }
 0xa16   :  { %v726_v50 = vadd.f32 1e-05, %v724_v15 }
 0xa18   :  { %1684 = vrsqrt.f32 %v726_v50  ;;  %vm743_vm1 = vweird.f32 %v726_v50 }
 0xa1e   :  { %v1685_v51 = vpop.eup %1684 }
 0xa1f   :  { %v738_v54 = vmul.f32 %v1685_v51, %v726_v50  ;;  %vm744_vm12 = vweird.f32 %v1685_v51 }
 0xa20   :  { %vm745_vm3 = vmor %vm743_vm1, %vm744_vm12 }
 0xa21   :  { %v739_v20 = vmul.f32 %v1685_v51, %v738_v54 }
 0xa23   :  { %v740_v52 = vmul.f32 0.5, %v739_v20 }
 0xa25   :  { %v741_v53 = vsub.f32 1.5, %v740_v52 }
 0xa27   :  { %v742_v55 = vmul.f32 %v1685_v51, %v741_v53 }
 0xa29   :  { %v746_v46 = vsel %vm745_vm3, %v1685_v51, %v742_v55 }
 0xa2a   :  { %v748_v47 = vmul.f32 %v746_v46, %v714_v63 }
 0xa2c   :  { %v751_v29 = vmul.f32 %v749_v27, %v748_v47 }
 0xa2e   :  { %v2184_v31 = vadd.f32 %v752_v42, %v751_v29 }
 0xa30   :  { %1496 = vmatmul.msk.f32.gmra.mxu0 %vm101_vm5, %v2184_v31 }
 0xa8d   :  { %v788_v56 = vpop.f32.mrf.mxu0 }
 0xa8e   :  { %v2197_v62 = vadd.f32 %v788_v56, %v764_v58 }
 0xaad   :  { %v791_v59 = vpop.f32.mrf.mxu0 }
 0xaae   :  { %v2189_v60 = vadd.f32 %v791_v59, %v764_v58 }
 0xab0   :  { %802 = vrot.lane.b32.xlu1 %v2189_v60, %s1740_s15  ;;  %804 = vrot.lane.b32.xlu0 %v2189_v60, %s1738_s13 }
 0xab1   :  { %806 = vrot.lane.b32.xlu2 %v2189_v60, %s1739_s14 }
 0xab8   :  { %799 = vrot.lane.b32.xlu0 %v2197_v62, %s1739_s14 }
 0xab9   :  { %797 = vrot.lane.b32.xlu2 %v2197_v62, %s1738_s13 }
 0xac0   :  { %795 = vrot.lane.b32.xlu0 %v2197_v62, %s1740_s15 }
 0xb0b   :  { %v2205_v48 = vpop.permute.xlu2 %806 }
 0xb0c   :  { %822 = vrot.lane.b32.xlu2 %v2205_v48, %s1741_s16 }
 0xb13   :  { %v2213_v2 = vpop.permute.xlu2 %797 }
 0xb14   :  { %816 = vrot.lane.b32.xlu2 %v2189_v60, %s1741_s16 }
 0xb22   :  { %v803_v0 = vpop.permute.xlu1 %802  ;;  %v805_v1 = vpop.permute.xlu0 %804 }
 0xb23   :  { %818 = vrot.lane.b32.xlu0 %v803_v0, %s1741_s16  ;;  %820 = vrot.lane.b32.xlu1 %v805_v1, %s1741_s16  ;;  %v1586_v33 = vpack.i.bf16 %v805_v1, %v2205_v48 }
 0xb2a   :  { %v2215_v5 = vpop.permute.xlu0 %799 }
 0xb2b   :  { %814 = vrot.lane.b32.xlu1 %v2215_v5, %s1741_s16  ;;  %812 = vrot.lane.b32.xlu0 %v2213_v2, %s1741_s16 }
 0xb32   :  { %v2221_v7 = vpop.permute.xlu0 %795 }
 0xb33   :  { %808 = vrot.lane.b32.xlu1 %v2197_v62, %s1741_s16  ;;  %810 = vrot.lane.b32.xlu2 %v2221_v7, %s1741_s16 }
 0xb66   :  { %v823_v57 = vpop.permute.xlu2 %822 }
 0xb67   :  { %1497 = vmatpush.xpose.msk.msrb.mxu1 %vm235_vm13, %v823_v57 }
 0xb6e   :  { %v817_v3 = vpop.permute.xlu2 %816 }
 0xb8d   :  { %v811_v63 = vpop.permute.xlu2 %810 }
 0xb95   :  { %v821_v10 = vpop.permute.xlu1 %820  ;;  %v819_v14 = vpop.permute.xlu0 %818 }
 0xb96   :  { %1498 = vmatpush.xpose.msk.msrb.mxu1 %vm235_vm13, %v821_v10 }
 0xb9a   :  { %1499 = vmatpush.xpose.msk.msrb.mxu1 %vm235_vm13, %v819_v14 }
 0xb9d   :  { %v815_v9 = vpop.permute.xlu1 %814  ;;  %v813_v6 = vpop.permute.xlu0 %812 }
 0xb9e   :  { %1500 = vmatpush.xpose.msk.msrb.mxu1 %vm235_vm13, %v817_v3 }
 0xba2   :  { %1501 = vmatpush.xpose.msk.msrb.mxu1 %vm235_vm13, %v815_v9 }
 0xba5   :  { %v809_v16 = vpop.permute.xlu1 %808 }
 0xba6   :  { %1502 = vmatpush.xpose.msk.msrb.mxu1 %vm235_vm13, %v813_v6 }
 0xbaa   :  { %1503 = vmatpush.xpose.msk.msrb.mxu1 %vm235_vm13, %v811_v63 }
 0xbae   :  { %1504 = vmatpush.xpose.msk.msrb.mxu1 %vm235_vm13, %v809_v16 }
 0xbb1   :  { %1505 = vmatmul.msk.f32.vlgmr.msrb.gmra.mxu1 %vm235_vm13, %v2197_v62 }
 0xbb9   :  { %1506 = vmatmul.msk.f32.gmra.mxu1 %vm235_vm13, %v2221_v7 }
 0xbc1   :  { %1507 = vmatmul.msk.f32.gmra.mxu1 %vm235_vm13, %v2213_v2 }
 0xbc9   :  { %1508 = vmatmul.msk.f32.gmra.mxu1 %vm235_vm13, %v2215_v5 }
 0xbd1   :  { %1509 = vmatmul.msk.f32.gmra.mxu1 %vm235_vm13, %v2189_v60 }
 0xbd9   :  { %1510 = vmatmul.msk.f32.gmra.mxu1 %vm235_vm13, %v803_v0 }
 0xbe1   :  { %1511 = vmatmul.msk.f32.gmra.mxu1 %vm235_vm13, %v805_v1 }
 0xbe9   :  { %1512 = vmatmul.msk.f32.gmra.mxu1 %vm235_vm13, %v2205_v48 }
 0xc2e   :  { %v873_v18 = vpop.f32.mrf.mxu1 }
 0xc2f   :  { %v874_v26 = vadd.f32 %v873_v18, %v1952_v41 }
 0xc31   :  { %v897_v28 = vsel %vm309_vm14, %v874_v26, -inf }
 0xc32   :  { %898 = vmax.xlane.f32.xlu0 %v897_v28 }
 0xc36   :  { %v876_v17 = vpop.f32.mrf.mxu1 }
 0xc37   :  { %v877_v32 = vadd.f32 %v876_v17, %v1959_v45 }
 0xc39   :  { %v900_v25 = vsel %vm309_vm14, %v877_v32, -inf }
 0xc3a   :  { %901 = vmax.xlane.f32.xlu2 %v900_v25 }
 0xc3e   :  { %v879_v30 = vpop.f32.mrf.mxu1 }
 0xc3f   :  { %v2254_v34 = vadd.f32 %v879_v30, %v1966_v49  ;;  %v1591_v49 = vpack.i.bf16 %v2189_v60, %v803_v0 }
 0xc41   :  { %v903_v36 = vsel %vm309_vm14, %v2254_v34, -inf }
 0xc42   :  { %904 = vmax.xlane.f32.xlu1 %v903_v36 }
 0xc46   :  { %v882_v37 = vpop.f32.mrf.mxu1 }
 0xc47   :  { %v883_v41 = vadd.f32 %v882_v37, %v1998_v8 }
 0xc49   :  { %v906_v27 = vsel %vm309_vm14, %v883_v41, -inf }
 0xc4a   :  { %907 = vmax.xlane.f32.xlu0 %v906_v27 }
 0xc4e   :  { %v885_v38 = vpop.f32.mrf.mxu1 }
 0xc4f   :  { %v886_v45 = vadd.f32 %v885_v38, %v1978_v61 }
 0xc51   :  { %v909_v40 = vsel %vm309_vm14, %v886_v45, -inf }
 0xc52   :  { %910 = vmax.xlane.f32.xlu2 %v909_v40 }
 0xc56   :  { %v888_v42 = vpop.f32.mrf.mxu1 }
 0xc57   :  { %v2269_v61 = vadd.f32 %v888_v42, %v2005_v11 }
 0xc59   :  { %v912_v54 = vsel %vm309_vm14, %v2269_v61, -inf }
 0xc5b   :  { %1592 = vrot.lane.b32.xlu1 %v1591_v49, %s1742_s23 }
 0xc5e   :  { %v891_v44 = vpop.f32.mrf.mxu1  ;;  %1587 = vrot.lane.b32.xlu0 %v1586_v33, %s1742_s23 }
 0xc5f   :  { %v892_v8 = vadd.f32 %v891_v44, %v1991_v4  ;;  %v1601_v4 = vpack.i.bf16 %v2197_v62, %v2221_v7  ;;  %v1596_v7 = vpack.i.bf16 %v2213_v2, %v2215_v5 }
 0xc61   :  { %v915_v15 = vsel %vm309_vm14, %v892_v8, -inf }
 0xc62   :  { %916 = vmax.xlane.f32.xlu2 %v915_v15 }
 0xc66   :  { %v894_v50 = vpop.f32.mrf.mxu1 }
 0xc67   :  { %v2272_v51 = vadd.f32 %v894_v50, %v2011_v13 }
 0xc69   :  { %v918_v20 = vsel %vm309_vm14, %v2272_v51, -inf }
 0xc85   :  { %913 = vmax.xlane.f32.xlu1 %v912_v54 }
 0xc88   :  { %919 = vmax.xlane.f32.xlu0 %v918_v20 }
 0xc9e   :  { %1602 = vrot.lane.b32.xlu1 %v1601_v4, %s1742_s23 }
 0xca5   :  { %v899_v52 = vpop.xlane.xlu0 %898 }
 0xca6   :  { %v921_v11 = vsub.f32 %v874_v26, %v899_v52 }
 0xca8   :  { %v929_v53 = vmul.f32 1.442695, %v921_v11 }
 0xcaa   :  { %1686 = vpow2.f32 %v929_v53 }
 0xcad   :  { %v902_v46 = vpop.xlane.xlu2 %901 }
 0xcae   :  { %v922_v47 = vsub.f32 %v877_v32, %v902_v46 }
 0xcb0   :  { %v2281_v55 = vpop.eup %1686  ;;  %v931_v29 = vmul.f32 1.442695, %v922_v47 }
 0xcb1   :  { %v945_v13 = vsel %vm309_vm14, %v2281_v55, 0.0 }
 0xcb2   :  { %946 = vadd.xlane.f32.xlu2 %v945_v13  ;;  %1688 = vpow2.f32 %v931_v29 }
 0xcb5   :  { %v905_v14 = vpop.xlane.xlu1 %904 }
 0xcb6   :  { %v923_v25 = vsub.f32 %v2254_v34, %v905_v14 }
 0xcb8   :  { %v2285_v60 = vpop.eup %1688  ;;  %v933_v36 = vmul.f32 1.442695, %v923_v25 }
 0xcb9   :  { %v948_v0 = vsel %vm309_vm14, %v2285_v60, 0.0 }
 0xcbd   :  { %v908_v56 = vpop.xlane.xlu0 %907 }
 0xcbe   :  { %v924_v58 = vsub.f32 %v883_v41, %v908_v56 }
 0xcc0   :  { %v935_v59 = vmul.f32 1.442695, %v924_v58 }
 0xcc2   :  { %1690 = vpow2.f32 %v935_v59 }
 0xcc5   :  { %v911_v62 = vpop.xlane.xlu2 %910 }
 0xcc6   :  { %v925_v48 = vsub.f32 %v886_v45, %v911_v62 }
 0xcc8   :  { %v2289_v1 = vpop.eup %1690  ;;  %v937_v57 = vmul.f32 1.442695, %v925_v48  ;;  %949 = vadd.xlane.f32.xlu1 %v948_v0 }
 0xcc9   :  { %v954_v10 = vsel %vm309_vm14, %v2289_v1, 0.0 }
 0xcca   :  { %1692 = vpow2.f32 %v937_v57  ;;  %1597 = vrot.lane.b32.xlu2 %v1596_v7, %s1742_s23  ;;  %955 = vadd.xlane.f32.xlu0 %v954_v10 }
 0xccd   :  { %v1593_v16 = vpop.permute.xlu1 %1592 }
 0xcce   :  { %v1594_v5 = vunpack.i.l.bf16 %v1593_v16  ;;  %v1595_v28 = vunpack.i.h.bf16 %v1593_v16 }
 0xcd0   :  { %v2296_v3 = vpop.eup %1692  ;;  %v1588_v9 = vpop.permute.xlu0 %1587 }
 0xcd1   :  { %v1589_v6 = vunpack.i.l.bf16 %v1588_v9  ;;  %v957_v63 = vsel %vm309_vm14, %v2296_v3, 0.0  ;;  %v1590_v2 = vunpack.i.h.bf16 %v1588_v9 }
 0xcd2   :  { %958 = vadd.xlane.f32.xlu0 %v957_v63 }
 0xcd3   :  { %1041 = vmatpush.msrb.mxu0 %v1589_v6 }
 0xcd5   :  { %v917_v18 = vpop.xlane.xlu2 %916  ;;  %1042 = vmatpush.msrb.mxu0 %v1590_v2 }
 0xcd6   :  { %v927_v26 = vsub.f32 %v892_v8, %v917_v18 }
 0xcd7   :  { %1043 = vmatpush.msrb.mxu0 %v1594_v5 }
 0xcd8   :  { %v941_v17 = vmul.f32 1.442695, %v927_v26 }
 0xcd9   :  { %1044 = vmatpush.msrb.mxu0 %v1595_v28 }
 0xcda   :  { %1694 = vpow2.f32 %v941_v17 }
 0xcdb   :  { %1696 = vpow2.f32 %v933_v36 }
 0xce0   :  { %v2300_v32 = vpop.eup %1694 }
 0xce1   :  { %v963_v30 = vsel %vm309_vm14, %v2300_v32, 0.0  ;;  %v1697_v37 = vpop.eup %1696 }
 0xce2   :  { %964 = vadd.xlane.f32.xlu0 %v963_v30  ;;  %v951_v41 = vsel %vm309_vm14, %v1697_v37, 0.0 }
 0xcf3   :  { %952 = vadd.xlane.f32.xlu2 %v951_v41 }
 0xcf8   :  { %v914_v27 = vpop.xlane.xlu1 %913 }
 0xcf9   :  { %v926_v38 = vsub.f32 %v2269_v61, %v914_v27 }
 0xcfb   :  { %v939_v45 = vmul.f32 1.442695, %v926_v38  ;;  %v920_v40 = vpop.xlane.xlu0 %919 }
 0xcfc   :  { %v928_v42 = vsub.f32 %v2272_v51, %v920_v40 }
 0xcfd   :  { %1698 = vpow2.f32 %v939_v45 }
 0xcfe   :  { %v943_v49 = vmul.f32 1.442695, %v928_v42 }
 0xd00   :  { %1700 = vpow2.f32 %v943_v49 }
 0xd03   :  { %v1699_v34 = vpop.eup %1698 }
 0xd04   :  { %v960_v33 = vsel %vm309_vm14, %v1699_v34, 0.0 }
 0xd05   :  { %961 = vadd.xlane.f32.xlu1 %v960_v33 }
 0xd06   :  { %v1701_v44 = vpop.eup %1700 }
 0xd07   :  { %v966_v8 = vsel %vm309_vm14, %v1701_v44, 0.0 }
 0xd08   :  { %967 = vadd.xlane.f32.xlu2 %v966_v8 }
 0xd10   :  { %v1603_v51 = vpop.permute.xlu1 %1602 }
 0xd11   :  { %v1604_v4 = vunpack.i.l.bf16 %v1603_v51  ;;  %v1605_v52 = vunpack.i.h.bf16 %v1603_v51 }
 0xd1e   :  { %1607 = vrot.lane.b32.xlu1 %v1606_v21, %s1743_s1 }
 0xd20   :  { %1612 = vrot.lane.b32.xlu2 %v1611_v24, %s1743_s1 }
 0xd25   :  { %v947_v15 = vpop.xlane.xlu2 %946 }
 0xd26   :  { %1702 = vrcp.f32 %v947_v15 }
 0xd2c   :  { %v1703_v20 = vpop.eup %1702 }
 0xd2d   :  { %v1598_v61 = vpop.permute.xlu2 %1597  ;;  %v977_v19 = vmul.f32 %v1703_v20, %v2281_v55 }
 0xd2e   :  { %v1599_v50 = vunpack.i.l.bf16 %v1598_v61  ;;  %v1600_v54 = vunpack.i.h.bf16 %v1598_v61 }
 0xd30   :  { %1045 = vmatpush.msrb.mxu0 %v1599_v50 }
 0xd32   :  { %1046 = vmatpush.msrb.mxu0 %v1600_v54 }
 0xd34   :  { %1047 = vmatpush.msrb.mxu0 %v1604_v4 }
 0xd36   :  { %1048 = vmatpush.msrb.mxu0 %v1605_v52 }
 0xd37   :  { %1513 = vmatmul.msk.f32.vlgmr.msrb.gmra.mxu0 %vm309_vm14, %v977_v19 }
 0xd3b   :  { %v950_v12 = vpop.xlane.xlu1 %949 }
 0xd3c   :  { %1704 = vrcp.f32 %v950_v12 }
 0xd3d   :  { %v956_v24 = vpop.xlane.xlu0 %955 }
 0xd42   :  { %v1705_v21 = vpop.eup %1704 }
 0xd43   :  { %v978_v22 = vmul.f32 %v1705_v21, %v2285_v60 }
 0xd45   :  { %1514 = vmatmul.msk.f32.gmra.mxu0 %vm309_vm14, %v978_v22  ;;  %v959_v13 = vpop.xlane.xlu0 %958 }
 0xd55   :  { %v965_v58 = vpop.xlane.xlu0 %964 }
 0xd66   :  { %v953_v23 = vpop.xlane.xlu2 %952 }
 0xd67   :  { %1706 = vrcp.f32 %v953_v23 }
 0xd68   :  { %1708 = vrcp.f32 %v956_v24 }
 0xd69   :  { %1710 = vrcp.f32 %v959_v13  ;;  %v1488_v13 = vld [vmem:[%s2465_s3 + $0x48] sm:$0xff] }
 0xd6d   :  { %v1707_v11 = vpop.eup %1706 }
 0xd6e   :  { %v979_v53 = vmul.f32 %v1707_v11, %v1697_v37  ;;  %v1709_v55 = vpop.eup %1708  ;;  %v1492_v11 = vld [vmem:[%s2465_s3 + $0x68] sm:$0xff] }
 0xd6f   :  { %v980_v46 = vmul.f32 %v1709_v55, %v2289_v1  ;;  %v1711_v29 = vpop.eup %1710 }
 0xd70   :  { %1515 = vmatmul.msk.f32.gmra.mxu0 %vm309_vm14, %v979_v53  ;;  %v981_v56 = vmul.f32 %v1711_v29, %v2296_v3  ;;  %v1490_v53 = vld [vmem:[%s2465_s3 + $0x58] sm:$0xff] }
 0xd78   :  { %1516 = vmatmul.msk.f32.gmra.mxu0 %vm309_vm14, %v980_v46  ;;  %v962_v47 = vpop.xlane.xlu1 %961 }
 0xd79   :  { %1712 = vrcp.f32 %v962_v47 }
 0xd7a   :  { %1714 = vrcp.f32 %v965_v58 }
 0xd7b   :  { %v968_v62 = vpop.xlane.xlu2 %967 }
 0xd7c   :  { %1716 = vrcp.f32 %v968_v62 }
 0xd7f   :  { %v1713_v59 = vpop.eup %1712 }
 0xd80   :  { %1517 = vmatmul.msk.f32.gmra.mxu0 %vm309_vm14, %v981_v56  ;;  %v982_v60 = vmul.f32 %v1713_v59, %v1699_v34  ;;  %v1715_v48 = vpop.eup %1714  ;;  %v1104_v34 = vperm.slane %v2175_v35, 3 }
 0xd81   :  { %v983_v0 = vmul.f32 %v1715_v48, %v2300_v32  ;;  %v1196_v48 = vperm.slane %v2175_v35, 4 }
 0xd82   :  { %v1717_v1 = vpop.eup %1716 }
 0xd83   :  { %v984_v7 = vmul.f32 %v1717_v1, %v1701_v44  ;;  %v1613_v26 = vpop.permute.xlu2 %1612 }
 0xd84   :  { %v1614_v28 = vunpack.i.l.bf16 %v1613_v26  ;;  %v1615_v17 = vunpack.i.h.bf16 %v1613_v26 }
 0xd88   :  { %1518 = vmatmul.msk.f32.gmra.mxu0 %vm309_vm14, %v982_v60 }
 0xd90   :  { %1519 = vmatmul.msk.f32.gmra.mxu0 %vm309_vm14, %v983_v0  ;;  %v1608_v2 = vpop.permute.xlu1 %1607 }
 0xd91   :  { %v1609_v5 = vunpack.i.l.bf16 %v1608_v2  ;;  %v1610_v18 = vunpack.i.h.bf16 %v1608_v2 }
 0xd93   :  { %1139 = vmatpush.msrb.mxu3 %v1609_v5 }
 0xd95   :  { %1140 = vmatpush.msrb.mxu3 %v1610_v18 }
 0xd97   :  { %1141 = vmatpush.msrb.mxu3 %v1614_v28 }
 0xd98   :  { %1520 = vmatmul.msk.f32.gmra.mxu0 %vm309_vm14, %v984_v7  ;;  %v1199_v7 = vperm.slane %v2175_v35, 5 }
 0xd99   :  { %1142 = vmatpush.msrb.mxu3 %v1615_v17 }
 0xdb4   :  { %v1050_v57 = vpop.f32.mrf.mxu0 }
 0xdc2   :  { %v1053_v10 = vpop.f32.mrf.mxu0 }
 0xdc3   :  { %1075 = vrot.lane.b32.xlu0 %v1053_v10, %s1744_s10 }
 0xded   :  { %v1056_v14 = vpop.f32.mrf.mxu0 }
 0xdee   :  { %1079 = vrot.lane.b32.xlu0 %v1056_v14, %s1745_s11 }
 0xdf5   :  { %v1059_v3 = vpop.f32.mrf.mxu0 }
 0xdf6   :  { %1083 = vrot.lane.b32.xlu1 %v1059_v3, %s1746_s12 }
 0xdfd   :  { %v1062_v9 = vpop.f32.mrf.mxu0 }
 0xe05   :  { %v1065_v6 = vpop.f32.mrf.mxu0 }
 0xe06   :  { %1090 = vrot.lane.b32.xlu2 %v1065_v6, %s1744_s10 }
 0xe0d   :  { %v1068_v63 = vpop.f32.mrf.mxu0 }
 0xe0e   :  { %1094 = vrot.lane.b32.xlu0 %v1068_v63, %s1745_s11 }
 0xe15   :  { %v1071_v16 = vpop.f32.mrf.mxu0 }
 0xe16   :  { %1098 = vrot.lane.b32.xlu1 %v1071_v16, %s1746_s12 }
 0xe35   :  { %v1076_v32 = vpop.permute.xlu0 %1075 }
 0xe36   :  { %v1086_v30 = vsel %vm235_vm13, %v1050_v57, %v1076_v32 }
 0xe60   :  { %v1080_v25 = vpop.permute.xlu0 %1079  ;;  %v1091_v27 = vpop.permute.xlu2 %1090 }
 0xe61   :  { %v1087_v36 = vsel %vm500_vm15, %v1086_v30, %v1080_v25  ;;  %v1101_v45 = vsel %vm235_vm13, %v1062_v9, %v1091_v27  ;;  %v1532_v25 = vld [vmem:[%s2468_s4 + $0x78] sm:$0xff]  ;;  %v1531_v30 = vld [vmem:[%s2468_s4 + $0x70] sm:$0xff] }
 0xe62   :  { %1274 = vmatpush.msra.mxu3 %v1532_v25  ;;  %v1527_v27 = vld [vmem:[%s2468_s4 + $0x50] sm:$0xff] }
 0xe64   :  { %1275 = vmatpush.msra.mxu3 %v1531_v30  ;;  %v1348_v30 = vld [vmem:[%s2469_s5 + $0x38] sm:$0xff] }
 0xe68   :  { %v1084_v37 = vpop.permute.xlu1 %1083 }
 0xe69   :  { %v1088_v41 = vsel %vm502_vm0, %v1087_v36, %v1084_v37  ;;  %v1530_v36 = vld [vmem:[%s2468_s4 + $0x68] sm:$0xff]  ;;  %v1529_v37 = vld [vmem:[%s2468_s4 + $0x60] sm:$0xff] }
 0xe6a   :  { %1521 = vmatmul.msk.f32.vlgmr.msrb.gmra.mxu3 %vm101_vm5, %v1088_v41  ;;  %v1528_v41 = vld [vmem:[%s2468_s4 + $0x58] sm:$0xff] }
 0xe6b   :  { %1276 = vmatpush.msra.mxu3 %v1530_v36 }
 0xe6d   :  { %1277 = vmatpush.msra.mxu3 %v1529_v37 }
 0xe6f   :  { %1278 = vmatpush.msra.mxu3 %v1528_v41 }
 0xe71   :  { %1279 = vmatpush.msra.mxu3 %v1527_v27 }
 0xe80   :  { %v1095_v38 = vpop.permute.xlu0 %1094 }
 0xe81   :  { %v1102_v40 = vsel %vm500_vm15, %v1101_v45, %v1095_v38  ;;  %v1526_v38 = vld [vmem:[%s2468_s4 + $0x48] sm:$0xff]  ;;  %v1525_v45 = vld [vmem:[%s2468_s4 + $0x40] sm:$0xff] }
 0xe82   :  { %1280 = vmatpush.msra.mxu3 %v1526_v38  ;;  %v2442_v38 = vld [vmem:[%s2466_s6 + $0x10] sm:$0xf] }
 0xe84   :  { %1281 = vmatpush.msra.mxu3 %v1525_v45 }
 0xe88   :  { %v1099_v42 = vpop.permute.xlu1 %1098 }
 0xe89   :  { %v1103_v49 = vsel %vm502_vm0, %v1102_v40, %v1099_v42  ;;  %v1202_v40 = vperm.slane %v2175_v35, 6 }
 0xe8a   :  { %1522 = vmatmul.msk.f32.gmra.mxu3 %vm101_vm5, %v1103_v49 }
 0xeed   :  { %v1144_v33 = vpop.f32.mrf.mxu3 }
 0xeee   :  { %v1145_v44 = vadd.f32 %v1144_v33, %v1104_v34 }
 0xef0   :  { %v1150_v8 = vadd.f32 %v1145_v44, %v2179_v43  ;;  %v1494_v43 = vld [vmem:[%s2465_s3 + $0x78] sm:$0xff] }
 0xef1   :  { %1221 = vmatpush.msrb.mxu2 %v1494_v43 }
 0xef2   :  { %v1152_v15 = vsel %vm101_vm5, %v1150_v8, 0.0 }
 0xef3   :  { %1153 = vadd.xlane.f32.xlu2 %v1152_v15  ;;  %1222 = vmatpush.msrb.mxu2 %v1492_v11  ;;  %v1259_v11 = vperm.slane %v2175_v35, 7 }
 0xef5   :  { %1223 = vmatpush.msrb.mxu2 %v1490_v53 }
 0xef7   :  { %1224 = vmatpush.msrb.mxu2 %v1488_v13 }
 0xf0d   :  { %v1147_v61 = vpop.f32.mrf.mxu3 }
 0xf0e   :  { %v1148_v50 = vadd.f32 %v1147_v61, %v1104_v34 }
 0xf10   :  { %v1151_v51 = vadd.f32 %v1148_v50, %v2184_v31 }
 0xf12   :  { %v1155_v54 = vsel %vm101_vm5, %v1151_v51, 0.0 }
 0xf13   :  { %1156 = vadd.xlane.f32.xlu0 %v1155_v54 }
 0xf66   :  { %v1154_v20 = vpop.xlane.xlu2 %1153 }
 0xf67   :  { %v1158_v4 = vmul.f32 %v1154_v20, %v1833_v39 }
 0xf69   :  { %v1160_v52 = vsub.f32 %v1150_v8, %v1158_v4 }
 0xf6b   :  { %v1162_v19 = vmul.f32 %v1160_v52, %v1160_v52 }
 0xf6d   :  { %v1164_v12 = vsel %vm101_vm5, %v1162_v19, 0.0 }
 0xf6e   :  { %1165 = vadd.xlane.f32.xlu1 %v1164_v12 }
 0xf86   :  { %v1157_v21 = vpop.xlane.xlu0 %1156 }
 0xf87   :  { %v1159_v22 = vmul.f32 %v1157_v21, %v1833_v39 }
 0xf89   :  { %v1161_v31 = vsub.f32 %v1151_v51, %v1159_v22 }
 0xf8b   :  { %v1163_v23 = vmul.f32 %v1161_v31, %v1161_v31 }
 0xf8d   :  { %v1167_v24 = vsel %vm101_vm5, %v1163_v23, 0.0 }
 0xf8e   :  { %1168 = vadd.xlane.f32.xlu2 %v1167_v24 }
 0xfe1   :  { %v1166_v55 = vpop.xlane.xlu1 %1165 }
 0xfe2   :  { %v1170_v46 = vmul.f32 %v1166_v55, %v1833_v39 }
 0xfe4   :  { %v1172_v47 = vadd.f32 1e-05, %v1170_v46 }
 0xfe6   :  { %1718 = vrsqrt.f32 %v1172_v47  ;;  %vm1180_vm15 = vweird.f32 %v1172_v47 }
 0xfec   :  { %v1719_v29 = vpop.eup %1718 }
 0xfed   :  { %v1175_v56 = vmul.f32 %v1719_v29, %v1172_v47  ;;  %vm1181_vm13 = vweird.f32 %v1719_v29 }
 0xfee   :  { %vm1182_vm0 = vmor %vm1180_vm15, %vm1181_vm13 }
 0xfef   :  { %v1176_v58 = vmul.f32 %v1719_v29, %v1175_v56 }
 0xff1   :  { %v1177_v59 = vmul.f32 0.5, %v1176_v58 }
 0xff3   :  { %v1178_v60 = vsub.f32 1.5, %v1177_v59 }
 0xff5   :  { %v1179_v62 = vmul.f32 %v1719_v29, %v1178_v60 }
 0xff7   :  { %v1183_v0 = vsel %vm1182_vm0, %v1719_v29, %v1179_v62 }
 0xff8   :  { %v1194_v1 = vmul.f32 %v1183_v0, %v1160_v52 }
 0xffa   :  { %v1197_v57 = vmul.f32 %v1196_v48, %v1194_v1 }
 0xffc   :  { %v2369_v10 = vadd.f32 %v1199_v7, %v1197_v57 }
 0xffe   :  { %1523 = vmatmul.msk.f32.vlgmr.msrb.gmra.mxu2 %vm101_vm5, %v2369_v10 }
0x1001   :  { %v1169_v14 = vpop.xlane.xlu2 %1168 }
0x1002   :  { %v1171_v3 = vmul.f32 %v1169_v14, %v1833_v39  ;;  %v1344_v14 = vld [vmem:[%s2469_s5 + $0x30] sm:$0xff] }
0x1003   :  { %1368 = vmatpush.msra.mxu2 %v1344_v14  ;;  %v1616_v37 = vpack.i.bf16 %v1348_v30, %v1344_v14  ;;  %v1381_v14 = vperm.slane %v2442_v38, 3 }
0x1004   :  { %v1173_v9 = vadd.f32 1e-05, %v1171_v3  ;;  %v1343_v3 = vld [vmem:[%s2469_s5 + $0x20] sm:$0xff] }
0x1005   :  { %1369 = vmatpush.msra.mxu2 %v1343_v3 }
0x1006   :  { %1720 = vrsqrt.f32 %v1173_v9  ;;  %vm1190_vm6 = vweird.f32 %v1173_v9 }
0x100c   :  { %v1721_v6 = vpop.eup %1720 }
0x100d   :  { %v1185_v63 = vmul.f32 %v1721_v6, %v1173_v9  ;;  %vm1191_vm4 = vweird.f32 %v1721_v6  ;;  %v1347_v9 = vld [vmem:[%s2469_s5 + $0x28] sm:$0xff] }
0x100e   :  { %vm1192_vm7 = vmor %vm1190_vm6, %vm1191_vm4 }
0x100f   :  { %v1186_v16 = vmul.f32 %v1721_v6, %v1185_v63  ;;  %v1346_v63 = vld [vmem:[%s2469_s5 + $0x18] sm:$0xff] }
0x1011   :  { %v1187_v2 = vmul.f32 0.5, %v1186_v16  ;;  %v1621_v16 = vpack.i.bf16 %v1347_v9, %v1343_v3 }
0x1013   :  { %v1188_v5 = vsub.f32 1.5, %v1187_v2 }
0x1015   :  { %v1189_v18 = vmul.f32 %v1721_v6, %v1188_v5  ;;  %v1341_v5 = vld [vmem:[%s2469_s5] sm:$0xff] }
0x1017   :  { %v1193_v26 = vsel %vm1192_vm7, %v1721_v6, %v1189_v18  ;;  %v1342_v6 = vld [vmem:[%s2469_s5 + $0x10] sm:$0xff]  ;;  %v1345_v18 = vld [vmem:[%s2469_s5 + $0x8] sm:$0xff] }
0x1018   :  { %v1195_v28 = vmul.f32 %v1193_v26, %v1161_v31  ;;  %v1626_v2 = vpack.i.bf16 %v1346_v63, %v1342_v6  ;;  %1370 = vmatpush.msra.mxu2 %v1342_v6 }
0x101a   :  { %v1198_v17 = vmul.f32 %v1196_v48, %v1195_v28  ;;  %1371 = vmatpush.msra.mxu2 %v1341_v5  ;;  %v1631_v28 = vpack.i.bf16 %v1345_v18, %v1341_v5 }
0x101c   :  { %v1201_v32 = vadd.f32 %v1199_v7, %v1198_v17 }
0x101e   :  { %1524 = vmatmul.msk.f32.gmra.mxu2 %vm101_vm5, %v1201_v32 }
0x1081   :  { %v1226_v42 = vpop.f32.mrf.mxu2 }
0x1082   :  { %v1227_v49 = vadd.f32 %v1226_v42, %v1202_v40  ;;  %v1335_v42 = vperm.slane %v2442_v38, 0 }
0x1084   :  { %v1232_v34 = vmul.f32 %v1227_v49, %v1227_v49 }
0x1086   :  { %v1234_v33 = vmul.f32 %v1232_v34, %v1227_v49 }
0x1088   :  { %v1236_v44 = vmul.f32 0.044715, %v1234_v33  ;;  %v1338_v33 = vperm.slane %v2442_v38, 1 }
0x108a   :  { %v1238_v8 = vadd.f32 %v1236_v44, %v1227_v49 }
0x108c   :  { %v1240_v15 = vmul.f32 0.7978846, %v1238_v8 }
0x108e   :  { %1722 = vtanh.f32 %v1240_v15 }
0x1094   :  { %v1723_v61 = vpop.eup %1722 }
0x1095   :  { %v1244_v50 = vadd.f32 1.0, %v1723_v61 }
0x1097   :  { %v1246_v51 = vmul.f32 0.5, %v1244_v50 }
0x1099   :  { %v1248_v54 = vmul.f32 %v1246_v51, %v1227_v49 }
0x109b   :  { %1533 = vmatmul.msk.f32.vlgmr.msra.gmra.mxu3 %vm309_vm14, %v1248_v54 }
0x10a1   :  { %v1229_v20 = vpop.f32.mrf.mxu2 }
0x10a2   :  { %v1230_v4 = vadd.f32 %v1229_v20, %v1202_v40 }
0x10a4   :  { %v1233_v52 = vmul.f32 %v1230_v4, %v1230_v4 }
0x10a6   :  { %v1235_v19 = vmul.f32 %v1233_v52, %v1230_v4 }
0x10a8   :  { %v1237_v12 = vmul.f32 0.044715, %v1235_v19 }
0x10aa   :  { %v1239_v43 = vadd.f32 %v1237_v12, %v1230_v4 }
0x10ac   :  { %v1241_v21 = vmul.f32 0.7978846, %v1239_v43 }
0x10ae   :  { %1724 = vtanh.f32 %v1241_v21 }
0x10b4   :  { %v1725_v22 = vpop.eup %1724 }
0x10b5   :  { %v1245_v31 = vadd.f32 1.0, %v1725_v22 }
0x10b7   :  { %v1247_v23 = vmul.f32 0.5, %v1245_v31 }
0x10b9   :  { %v1249_v24 = vmul.f32 %v1247_v23, %v1230_v4 }
0x10bb   :  { %1534 = vmatmul.msk.f32.gmra.mxu3 %vm309_vm14, %v1249_v24 }
0x111e   :  { %v1283_v53 = vpop.f32.mrf.mxu3 }
0x111f   :  { %v1284_v13 = vadd.f32 %v1283_v53, %v1259_v11 }
0x1121   :  { %v1289_v55 = vadd.f32 %v1284_v13, %v2369_v10 }
0x1123   :  { %v1291_v46 = vsel %vm101_vm5, %v1289_v55, 0.0 }
0x1124   :  { %1292 = vadd.xlane.f32.xlu0 %v1291_v46 }
0x113e   :  { %v1286_v47 = vpop.f32.mrf.mxu3 }
0x113f   :  { %v1287_v29 = vadd.f32 %v1286_v47, %v1259_v11 }
0x1141   :  { %v1290_v56 = vadd.f32 %v1287_v29, %v1201_v32 }
0x1143   :  { %v1294_v58 = vsel %vm101_vm5, %v1290_v56, 0.0 }
0x1144   :  { %1295 = vadd.xlane.f32.xlu1 %v1294_v58 }
0x115d   :  { %1617 = vrot.lane.b32.xlu1 %v1616_v37, %s1741_s16 }
0x1197   :  { %v1293_v59 = vpop.xlane.xlu0 %1292 }
0x1198   :  { %v1297_v60 = vmul.f32 %v1293_v59, %v1833_v39 }
0x119a   :  { %v1299_v62 = vsub.f32 %v1289_v55, %v1297_v60 }
0x119c   :  { %v1301_v48 = vmul.f32 %v1299_v62, %v1299_v62 }
0x119e   :  { %v1303_v35 = vsel %vm101_vm5, %v1301_v48, 0.0  ;;  %v1349_v48 = vperm.slane %v2442_v38, 2 }
0x119f   :  { %1304 = vadd.xlane.f32.xlu2 %v1303_v35 }
0x11b7   :  { %v1296_v0 = vpop.xlane.xlu1 %1295  ;;  %1622 = vrot.lane.b32.xlu2 %v1621_v16, %s1741_s16 }
0x11b8   :  { %v1298_v1 = vmul.f32 %v1296_v0, %v1833_v39 }
0x11ba   :  { %v1300_v7 = vsub.f32 %v1290_v56, %v1298_v1 }
0x11bc   :  { %v1302_v57 = vmul.f32 %v1300_v7, %v1300_v7 }
0x11be   :  { %v1306_v10 = vsel %vm101_vm5, %v1302_v57, 0.0 }
0x11bf   :  { %1307 = vadd.xlane.f32.xlu0 %v1306_v10 }
0x11cf   :  { %v1618_v23 = vpop.permute.xlu1 %1617 }
0x11d0   :  { %v1620_v11 = vunpack.i.h.bf16 %v1618_v23  ;;  %v1619_v53 = vunpack.i.l.bf16 %v1618_v23 }
0x11d2   :  { %v1409_v47 = vsel %vm71_vm2, %v1619_v53, %v1620_v11 }
0x11d3   :  { %1627 = vrot.lane.b32.xlu0 %v1626_v2, %s1741_s16  ;;  %1432 = vmatpush.msrb.mxu3 %v1409_v47 }
0x11db   :  { %1632 = vrot.lane.b32.xlu0 %v1631_v28, %s1741_s16 }
0x1212   :  { %v1305_v26 = vpop.xlane.xlu2 %1304 }
0x1213   :  { %v1309_v17 = vmul.f32 %v1305_v26, %v1833_v39 }
0x1215   :  { %v1311_v32 = vadd.f32 1e-05, %v1309_v17 }
0x1217   :  { %1726 = vrsqrt.f32 %v1311_v32  ;;  %vm1319_vm8 = vweird.f32 %v1311_v32 }
0x121a   :  { %v1623_v13 = vpop.permute.xlu2 %1622 }
0x121b   :  { %v1625_v55 = vunpack.i.h.bf16 %v1623_v13  ;;  %v1624_v46 = vunpack.i.l.bf16 %v1623_v13 }
0x121d   :  { %v1727_v25 = vpop.eup %1726  ;;  %v1408_v59 = vsel %vm71_vm2, %v1624_v46, %v1625_v55 }
0x121e   :  { %v1314_v36 = vmul.f32 %v1727_v25, %v1311_v32  ;;  %vm1320_vm14 = vweird.f32 %v1727_v25  ;;  %1433 = vmatpush.msrb.mxu3 %v1408_v59 }
0x121f   :  { %vm1321_vm9 = vmor %vm1319_vm8, %vm1320_vm14 }
0x1220   :  { %v1315_v41 = vmul.f32 %v1727_v25, %v1314_v36 }
0x1222   :  { %v1316_v27 = vmul.f32 0.5, %v1315_v41 }
0x1224   :  { %v1317_v45 = vsub.f32 1.5, %v1316_v27 }
0x1226   :  { %v1318_v40 = vmul.f32 %v1727_v25, %v1317_v45 }
0x1228   :  { %v1322_v49 = vsel %vm1321_vm9, %v1727_v25, %v1318_v40 }
0x1229   :  { %v1333_v34 = vmul.f32 %v1322_v49, %v1299_v62 }
0x122b   :  { %v1336_v44 = vmul.f32 %v1335_v42, %v1333_v34 }
0x122d   :  { %v1339_v8 = vadd.f32 %v1338_v33, %v1336_v44 }
0x122f   :  { %1535 = vmatmul.msk.f32.vlgmr.msra.gmra.mxu2 %vm101_vm5, %v1339_v8 }
0x1232   :  { %v1308_v15 = vpop.xlane.xlu0 %1307 }
0x1233   :  { %v1310_v61 = vmul.f32 %v1308_v15, %v1833_v39 }
0x1235   :  { %v1312_v50 = vadd.f32 1e-05, %v1310_v61 }
0x1237   :  { %1728 = vrsqrt.f32 %v1312_v50  ;;  %vm1329_vm11 = vweird.f32 %v1312_v50 }
0x123d   :  { %v1729_v51 = vpop.eup %1728 }
0x123e   :  { %v1324_v54 = vmul.f32 %v1729_v51, %v1312_v50  ;;  %vm1330_vm10 = vweird.f32 %v1729_v51 }
0x123f   :  { %vm1331_vm12 = vmor %vm1329_vm11, %vm1330_vm10 }
0x1240   :  { %v1325_v20 = vmul.f32 %v1729_v51, %v1324_v54 }
0x1242   :  { %v1326_v4 = vmul.f32 0.5, %v1325_v20 }
0x1244   :  { %v1327_v52 = vsub.f32 1.5, %v1326_v4 }
0x1245   :  { %v1628_v31 = vpop.permute.xlu0 %1627 }
0x1246   :  { %v1328_v19 = vmul.f32 %v1729_v51, %v1327_v52  ;;  %v1630_v39 = vunpack.i.h.bf16 %v1628_v31  ;;  %v1629_v24 = vunpack.i.l.bf16 %v1628_v31 }
0x1248   :  { %v1332_v12 = vsel %vm1331_vm12, %v1729_v51, %v1328_v19  ;;  %v1407_v60 = vsel %vm71_vm2, %v1629_v24, %v1630_v39 }
0x1249   :  { %v1334_v43 = vmul.f32 %v1332_v12, %v1300_v7  ;;  %1434 = vmatpush.msrb.mxu3 %v1407_v60 }
0x124b   :  { %v1337_v21 = vmul.f32 %v1335_v42, %v1334_v43 }
0x124d   :  { %v1340_v22 = vadd.f32 %v1338_v33, %v1337_v21  ;;  %v1633_v29 = vpop.permute.xlu0 %1632 }
0x124e   :  { %v1635_v56 = vunpack.i.h.bf16 %v1633_v29  ;;  %v1634_v58 = vunpack.i.l.bf16 %v1633_v29 }
0x124f   :  { %1536 = vmatmul.msk.f32.gmra.mxu2 %vm101_vm5, %v1340_v22 }
0x1250   :  { %v1406_v62 = vsel %vm71_vm2, %v1634_v58, %v1635_v56 }
0x1251   :  { %1435 = vmatpush.msrb.mxu3 %v1406_v62 }
0x12b2   :  { %v1373_v35 = vpop.f32.mrf.mxu2 }
0x12b3   :  { %v1374_v0 = vadd.f32 %v1373_v35, %v1349_v48 }
0x12b5   :  { %1730 = vtanh.f32 %v1374_v0 }
0x12bb   :  { %v1731_v1 = vpop.eup %1730 }
0x12bc   :  { %1537 = vmatmul.msk.f32.vlgmr.msrb.gmra.mxu3 %vm101_vm5, %v1731_v1 }
0x12d2   :  { %v1376_v7 = vpop.f32.mrf.mxu2 }
0x12d3   :  { %v1377_v57 = vadd.f32 %v1376_v7, %v1349_v48 }
0x12d5   :  { %1732 = vtanh.f32 %v1377_v57 }
0x12db   :  { %v1733_v10 = vpop.eup %1732 }
0x12dc   :  { %1538 = vmatmul.msk.f32.gmra.mxu3 %vm101_vm5, %v1733_v10 }
0x133f   :  { %v1437_v3 = vpop.f32.mrf.mxu3 }
0x1340   :  { %v1438_v9 = vadd.f32 %v1437_v3, %v1381_v14 }
0x1342   :  { %1443 = vst [vmem:[%s2470_s7] sm:$0xff] %v1438_v9 }
0x135f   :  { %v1440_v6 = vpop.f32.mrf.mxu3 }
0x1360   :  { %v1441_v63 = vadd.f32 %v1440_v6, %v1381_v14 }
0x1362   :  { %1444 = vst [vmem:[%s2470_s7 + $0x8] sm:$0xff] %v1441_v63 }

</bundles_post_ra>
